<compile_context>
chip_gen: v6e
topology: v6e:2x2x1
jax: 0.10.0
libtpu: 0.0.40
codegen_flags: <defaults>
</compile_context>

<pallas_src>
import jax
import jax.numpy as jnp
import numpy as np
from jax import lax
from jax.experimental import pallas as pl
from jax.experimental.pallas import tpu as pltpu

# ----- small, module-consistent config -----
B, T, C = 2, 8, 32           # batch, seq_len, hidden_size
H = 4                         # num_attention_heads
R = C // H                    # attention_head_size
K = 3                         # kernel_size (K <= T)
PAD_L = K // 2                # padding_l
I = 64                        # intermediate_size
EPS = 1e-12                   # layer_norm_eps
NUM_LAYERS = 2                # inner_group_num (fused inside one kernel)

BT = B * T                    # flattened (batch * seq) rows
HK = H * K
VEC_W = 128                   # lane width of the packed slabs
BIAS_ROWS = 8                 # packed bias / LayerNorm rows per layer

assert C % H == 0 and K <= T

# ----- weight-slab row layout (all offsets multiples of 16 -> no bf16 relayouts) -----
def _ceil16(n):
    return -(-n // 16) * 16

ROW_GG = 0                                   # (HK, HK)   grouped-softmax selector
ROW_EC = ROW_GG + _ceil16(HK)                # (HK, K*C)  per-head tap -> lane expansion
ROW_SC = ROW_EC + _ceil16(HK)                # ((K-1)*BT, BT) zero-padded tap shifts
ROW_L0 = ROW_SC + _ceil16((K - 1) * BT)      # per-layer weights start here
OFF_QVW, OFF_DW, OFF_FW, OFF_FOW = 0, C, 2 * C, 3 * C
ROWS_PER_LAYER = 3 * C + I                   # 160
TOTAL_ROWS = ROW_L0 + NUM_LAYERS * ROWS_PER_LAYER
assert ROWS_PER_LAYER % 16 == 0 and TOTAL_ROWS % 16 == 0


def _layer_norm(x, gamma, beta):
    mu = jnp.mean(x, axis=-1, keepdims=True)
    var = jnp.mean((x - mu) ** 2, axis=-1, keepdims=True)
    return (x - mu) * lax.rsqrt(var + EPS) * gamma + beta


def _gelu_new(x):
    # hidden_act = "gelu_new" (tanh approximation), matches HF ACT2FN["gelu_new"]
    return 0.5 * x * (1.0 + jnp.tanh(0.7978845608028654 * (x + 0.044715 * x * x * x)))


def convbert_group_kernel(hs_ref, w_ref, b_ref, out_ref):
    x = hs_ref[...]                                        # (BT, C) f32 residual stream

    # host-built 0/1 selector constants, already bf16, loaded once and shared
    GG = w_ref[ROW_GG:ROW_GG + HK, 0:HK]                   # (HK, HK)
    E_cat = w_ref[ROW_EC:ROW_EC + HK, 0:K * C]             # (HK, K*C)
    S_cat = w_ref[ROW_SC:ROW_SC + (K - 1) * BT, 0:BT]      # ((K-1)*BT, BT)

    for l in range(NUM_LAYERS):          # static unroll; all slicing at trace time
        wb = ROW_L0 + l * ROWS_PER_LAYER
        qvw = w_ref[wb + OFF_QVW:wb + OFF_QVW + C, 0:C + HK]   # [vw | qw]  (C, C+HK)
        dw = w_ref[wb + OFF_DW:wb + OFF_DW + C, 0:C]           # dense.weight.t()
        fw = w_ref[wb + OFF_FW:wb + OFF_FW + C, 0:I]
        fow = w_ref[wb + OFF_FOW:wb + OFF_FOW + I, 0:C]
        bb = l * BIAS_ROWS
        qvb = b_ref[bb + 0:bb + 1, 0:C + HK]                   # [vb | qb]
        db = b_ref[bb + 1:bb + 2, 0:C]
        ln1g = b_ref[bb + 2:bb + 3, 0:C]
        ln1b = b_ref[bb + 3:bb + 4, 0:C]
        fb = b_ref[bb + 4:bb + 5, 0:I]
        fob = b_ref[bb + 5:bb + 6, 0:C]
        ln2g = b_ref[bb + 6:bb + 7, 0:C]
        ln2b = b_ref[bb + 7:bb + 8, 0:C]

        # ---- ConvbertAttention ----
        xb = x.astype(jnp.bfloat16)
        qv = jnp.dot(xb, qvw, preferred_element_type=jnp.float32) + qvb   # (BT, C+HK)
        v = qv[:, 0:C]                                                    # value proj
        q = qv[:, C:C + HK]                                               # tap logits

        # grouped (per-head) softmax over the K taps; the row-global max is exact for
        # every per-head softmax (attention mask omitted: it cancels here exactly).
        q = q - jnp.max(q, axis=1, keepdims=True)
        e = jnp.exp(q)
        denom = jnp.dot(e.astype(jnp.bfloat16), GG,
                        preferred_element_type=jnp.float32)               # per-head sums
        denom = jnp.maximum(denom, 1e-30)                                 # underflow guard
        p = e * pl.reciprocal(denom, approx=True)                         # (BT, HK)

        # dynamic lightweight conv: all K per-head->lane expansions in ONE matmul and
        # both zero-padded tap shifts of the value slab in ONE matmul.
        pk_all = jnp.dot(p.astype(jnp.bfloat16), E_cat,
                         preferred_element_type=jnp.float32)              # (BT, K*C)
        sv_cat = jnp.dot(S_cat, v.astype(jnp.bfloat16),
                         preferred_element_type=jnp.float32)              # ((K-1)*BT, C)

        conv = pk_all[:, PAD_L * C:(PAD_L + 1) * C] * v                   # centre tap
        idx = 0
        for k in range(K):
            if k == PAD_L:
                continue
            conv = conv + (pk_all[:, k * C:(k + 1) * C]
                           * sv_cat[idx * BT:(idx + 1) * BT, :])
            idx += 1

        proj = jnp.dot(conv.astype(jnp.bfloat16), dw,
                       preferred_element_type=jnp.float32) + db
        attn = _layer_norm(x + proj, ln1g, ln1b)

        # ---- ConvBERT FFN (ALBERT-style inner layer tail, retained from prev rev) ----
        h1 = _gelu_new(jnp.dot(attn.astype(jnp.bfloat16), fw,
                               preferred_element_type=jnp.float32) + fb)
        h2 = jnp.dot(h1.astype(jnp.bfloat16), fow,
                     preferred_element_type=jnp.float32) + fob
        x = _layer_norm(h2 + attn, ln2g, ln2b)

    out_ref[...] = x


def pack_params(layer_params):
    """Pack everything the kernel needs into exactly two HBM buffers:
       * (TOTAL_ROWS, 128) bf16 slab: selector constants (GG, E_cat, S_cat) + every
         layer's matmul weights (v|q fused, dense, ffn, ffn_output)  -> 1 DMA,
       * (NUM_LAYERS*8, 128) f32 pack: every bias / LayerNorm vector -> 1 DMA."""
    slab = np.zeros((TOTAL_ROWS, VEC_W), np.float32)
    bias = np.zeros((NUM_LAYERS * BIAS_ROWS, VEC_W), np.float32)

    def put(r0, mat):
        mat = np.asarray(mat, np.float32)
        slab[r0:r0 + mat.shape[0], 0:mat.shape[1]] = mat

    # ---- shared 0/1 selector constants (hoisted out of the kernel per review) ----
    i = np.arange(HK)
    put(ROW_GG, i[:, None] // K == i[None, :] // K)          # same-head indicator
    c = np.arange(C)
    e_cat = np.zeros((HK, K * C), np.float32)
    for k in range(K):
        e_cat[:, k * C:(k + 1) * C] = ((i[:, None] % K == k) &
                                       (i[:, None] // K == c[None, :] // R))
    put(ROW_EC, e_cat)                                        # tap -> lane expansion
    t = np.arange(BT)
    s_blocks = []
    for k in range(K):
        if k == PAD_L:
            continue
        sh = k - PAD_L
        valid = ((t % T) + sh >= 0) & ((t % T) + sh < T)      # stay inside the sequence
        s_blocks.append((t[None, :] == t[:, None] + sh) & valid[:, None])
    put(ROW_SC, np.concatenate(s_blocks, axis=0))             # zero-padded tap shifts

    # ---- per-layer weights & vectors ----
    for l, p in enumerate(layer_params):
        (qw, qb, vw, vb, dw, db, ln1g, ln1b, fw, fb, fow, fob, ln2g, ln2b) = p
        base = ROW_L0 + l * ROWS_PER_LAYER
        put(base + OFF_QVW, np.concatenate([np.asarray(vw), np.asarray(qw)], axis=1))
        put(base + OFF_DW, dw)
        put(base + OFF_FW, fw)
        put(base + OFF_FOW, fow)
        bb = l * BIAS_ROWS
        vecs = [np.concatenate([np.asarray(vb)[0], np.asarray(qb)[0]]),
                np.asarray(db)[0], np.asarray(ln1g)[0], np.asarray(ln1b)[0],
                np.asarray(fb)[0], np.asarray(fob)[0],
                np.asarray(ln2g)[0], np.asarray(ln2b)[0]]
        for r, vec in enumerate(vecs):
            bias[bb + r, 0:vec.shape[0]] = vec

    return jnp.asarray(slab, jnp.bfloat16), jnp.asarray(bias, jnp.float32)


def convbert_layer_group(hidden, packed, attention_mask=None):
    """hidden: (B, T, C).  attention_mask (additive, broadcastable to (B, T, 1, 1)) is
    accepted for interface parity only: it is broadcast-constant over (H, K), so it
    cancels exactly in the per-head softmax and is never sent to the kernel."""
    del attention_mask
    w_slab, bias_pack = packed
    hs = hidden.reshape(BT, C)

    full = lambda shape: pl.BlockSpec(shape, lambda i: (0,) * len(shape))
    out = pl.pallas_call(
        convbert_group_kernel,
        out_shape=jax.ShapeDtypeStruct((BT, C), jnp.float32),
        grid=(1,),
        in_specs=[
            full((BT, C)),                # hidden (flattened batch*seq), f32
            full(w_slab.shape),           # all weights + selector constants, bf16
            full(bias_pack.shape),        # all bias / LayerNorm vectors, f32
        ],
        out_specs=full((BT, C)),
        compiler_params=pltpu.CompilerParams(
            dimension_semantics=("arbitrary",)),
    )(hs, w_slab, bias_pack)
    return out.reshape(B, T, C)


# ----- deterministic parameter init (synthetic; no checkpoint) -----
def init_layer_params(key):
    ks = jax.random.split(key, 10)
    s = 0.02
    qw = jax.random.normal(ks[0], (C, H * K), jnp.float32) * s
    qb = jax.random.normal(ks[1], (1, H * K), jnp.float32) * s
    vw = jax.random.normal(ks[2], (C, C), jnp.float32) * s
    vb = jax.random.normal(ks[3], (1, C), jnp.float32) * s
    dw = jax.random.normal(ks[4], (C, C), jnp.float32) * s     # = dense.weight.t()
    db = jax.random.normal(ks[5], (1, C), jnp.float32) * s
    ln1g = jnp.ones((1, C), jnp.float32)
    ln1b = jnp.zeros((1, C), jnp.float32)
    fw = jax.random.normal(ks[6], (C, I), jnp.float32) * s
    fb = jax.random.normal(ks[7], (1, I), jnp.float32) * s
    fow = jax.random.normal(ks[8], (I, C), jnp.float32) * s
    fob = jax.random.normal(ks[9], (1, C), jnp.float32) * s
    ln2g = jnp.ones((1, C), jnp.float32)
    ln2b = jnp.zeros((1, C), jnp.float32)
    return (qw, qb, vw, vb, dw, db, ln1g, ln1b, fw, fb, fow, fob, ln2g, ln2b)


# ----- pure-JAX f32 reference (mirrors the PyTorch forward, mask included) -----
def ref_layer(x, mask4, params):
    (qw, qb, vw, vb, dw, db, ln1g, ln1b, fw, fb, fow, fob, ln2g, ln2b) = params
    q = (x @ qw + qb[0]).reshape(B, T, H, K) + mask4
    p = jax.nn.softmax(q, axis=-1)
    v = x @ vw + vb[0]
    vpad = jnp.pad(v, ((0, 0), (PAD_L, K - 1 - PAD_L), (0, 0)))
    xunf = jnp.stack([vpad[:, k:k + T, :] for k in range(K)], axis=-1)   # (B,T,C,K)
    xunf = xunf.reshape(B, T, H, R, K)
    out = jnp.einsum('bthrk,bthk->bthr', xunf, p).reshape(B, T, C)
    proj = out @ dw + db[0]
    attn = _layer_norm(x + proj, ln1g[0], ln1b[0])
    ffn = _gelu_new(attn @ fw + fb[0])
    ffn = ffn @ fow + fob[0]
    return _layer_norm(ffn + attn, ln2g[0], ln2b[0])


if __name__ == "__main__":
    key = jax.random.PRNGKey(0)
    keys = jax.random.split(key, 2 + NUM_LAYERS)
    k_hs, k_mask, k_layers = keys[0], keys[1], keys[2:]

    hidden = jax.random.normal(k_hs, (B, T, C), jnp.float32)
    # additive attention mask, broadcastable to (B, T, H, K) -> cancels in the softmax
    attention_mask = jax.random.normal(k_mask, (B, T, 1, 1), jnp.float32) * 0.1
    layer_params = [init_layer_params(k_layers[i]) for i in range(NUM_LAYERS)]
    packed = pack_params(layer_params)       # done once (load time in real use)

    out = convbert_layer_group(hidden, packed, attention_mask)
    out = jax.block_until_ready(out)

    # sanity check against the pure-JAX f32 reference (kernel matmuls are bf16,
    # softmax reciprocal is EUP-approx -> ~1e-3-level relative error, within tol)
    ref = hidden
    mask4 = jnp.broadcast_to(attention_mask, (B, T, H, K))
    for params in layer_params:
        ref = ref_layer(ref, mask4, params)
    assert out.shape == (B, T, C)
    assert bool(jnp.allclose(out, ref, atol=2e-2, rtol=2e-2)), \
        float(jnp.max(jnp.abs(out - ref)))

    print("KERNEL_OK")
</pallas_src>

<mosaic_0001>
module attributes {stable_mosaic.version = 11 : i64} {
  func.func @convbert_group_kernel(%arg0: i32, %arg1: memref<16x32xf32, #tpu.memory_space<vmem>>, %arg2: memref<384x128xbf16, #tpu.memory_space<vmem>>, %arg3: memref<16x128xf32, #tpu.memory_space<vmem>>, %arg4: memref<16x32xf32, #tpu.memory_space<vmem>>) attributes {dimension_semantics = [#tpu.dimension_semantics<arbitrary>], iteration_bounds = array<i64: 1>, scalar_prefetch = 0 : i64, scratch_operands = 0 : i64, tpu.core_type = #tpu.core_type<tc>, window_params = [{pipeline_mode = #tpu.pipeline_mode<synchronous>, transform_indices = @transform_0, window_bounds = array<i64: 16, 32>}, {pipeline_mode = #tpu.pipeline_mode<synchronous>, transform_indices = @transform_1, window_bounds = array<i64: 384, 128>}, {pipeline_mode = #tpu.pipeline_mode<synchronous>, transform_indices = @transform_2, window_bounds = array<i64: 16, 128>}, {pipeline_mode = #tpu.pipeline_mode<synchronous>, transform_indices = @transform_3, window_bounds = array<i64: 16, 32>}]} {
    %c0 = arith.constant 0 : index
    %c0_0 = arith.constant 0 : index
    %0 = vector.load %arg1[%c0, %c0_0] : memref<16x32xf32, #tpu.memory_space<vmem>>, vector<16x32xf32>
    %c0_1 = arith.constant 0 : index
    %c0_2 = arith.constant 0 : index
    %1 = vector.load %arg2[%c0_1, %c0_2] : memref<384x128xbf16, #tpu.memory_space<vmem>>, vector<12x12xbf16>
    %c16 = arith.constant 16 : index
    %c0_3 = arith.constant 0 : index
    %2 = vector.load %arg2[%c16, %c0_3] : memref<384x128xbf16, #tpu.memory_space<vmem>>, vector<12x96xbf16>
    %c32 = arith.constant 32 : index
    %c0_4 = arith.constant 0 : index
    %3 = vector.load %arg2[%c32, %c0_4] : memref<384x128xbf16, #tpu.memory_space<vmem>>, vector<32x16xbf16>
    %c64 = arith.constant 64 : index
    %c0_5 = arith.constant 0 : index
    %4 = vector.load %arg2[%c64, %c0_5] : memref<384x128xbf16, #tpu.memory_space<vmem>>, vector<32x44xbf16>
    %c96 = arith.constant 96 : index
    %c0_6 = arith.constant 0 : index
    %5 = vector.load %arg2[%c96, %c0_6] : memref<384x128xbf16, #tpu.memory_space<vmem>>, vector<32x32xbf16>
    %c128 = arith.constant 128 : index
    %c0_7 = arith.constant 0 : index
    %6 = vector.load %arg2[%c128, %c0_7] : memref<384x128xbf16, #tpu.memory_space<vmem>>, vector<32x64xbf16>
    %c160 = arith.constant 160 : index
    %c0_8 = arith.constant 0 : index
    %7 = vector.load %arg2[%c160, %c0_8] : memref<384x128xbf16, #tpu.memory_space<vmem>>, vector<64x32xbf16>
    %c0_9 = arith.constant 0 : index
    %c0_10 = arith.constant 0 : index
    %8 = vector.load %arg3[%c0_9, %c0_10] : memref<16x128xf32, #tpu.memory_space<vmem>>, vector<1x44xf32>
    %c1 = arith.constant 1 : index
    %c0_11 = arith.constant 0 : index
    %9 = vector.load %arg3[%c1, %c0_11] : memref<16x128xf32, #tpu.memory_space<vmem>>, vector<1x32xf32>
    %c2 = arith.constant 2 : index
    %c0_12 = arith.constant 0 : index
    %10 = vector.load %arg3[%c2, %c0_12] : memref<16x128xf32, #tpu.memory_space<vmem>>, vector<1x32xf32>
    %c3 = arith.constant 3 : index
    %c0_13 = arith.constant 0 : index
    %11 = vector.load %arg3[%c3, %c0_13] : memref<16x128xf32, #tpu.memory_space<vmem>>, vector<1x32xf32>
    %c4 = arith.constant 4 : index
    %c0_14 = arith.constant 0 : index
    %12 = vector.load %arg3[%c4, %c0_14] : memref<16x128xf32, #tpu.memory_space<vmem>>, vector<1x64xf32>
    %c5 = arith.constant 5 : index
    %c0_15 = arith.constant 0 : index
    %13 = vector.load %arg3[%c5, %c0_15] : memref<16x128xf32, #tpu.memory_space<vmem>>, vector<1x32xf32>
    %c6 = arith.constant 6 : index
    %c0_16 = arith.constant 0 : index
    %14 = vector.load %arg3[%c6, %c0_16] : memref<16x128xf32, #tpu.memory_space<vmem>>, vector<1x32xf32>
    %c7 = arith.constant 7 : index
    %c0_17 = arith.constant 0 : index
    %15 = vector.load %arg3[%c7, %c0_17] : memref<16x128xf32, #tpu.memory_space<vmem>>, vector<1x32xf32>
    %16 = arith.truncf %0 : vector<16x32xf32> to vector<16x32xbf16>
    %cst = arith.constant dense<0.000000e+00> : vector<16x44xf32>
    %17 = tpu.matmul %16, %4, %cst {dimension_numbers = #tpu.dot_dimension_numbers<[1], [0], [0], [1], [0, 0, 1, 1], [], []>} : vector<16x32xbf16>, vector<32x44xbf16>, vector<16x44xf32> -> vector<16x44xf32>
    %18 = vector.broadcast %8 : vector<1x44xf32> to vector<16x44xf32>
    %19 = arith.addf %17, %18 : vector<16x44xf32>
    %20 = vector.extract_strided_slice %19 {offsets = [0, 0], sizes = [16, 32], strides = [1, 1]} : vector<16x44xf32> to vector<16x32xf32>
    %21 = vector.extract_strided_slice %19 {offsets = [0, 32], sizes = [16, 12], strides = [1, 1]} : vector<16x44xf32> to vector<16x12xf32>
    %cst_18 = arith.constant dense<0xFF800000> : vector<16xf32>
    %22 = vector.multi_reduction <maximumf>, %21, %cst_18 [1] : vector<16x12xf32> to vector<16xf32>
    %23 = vector.shape_cast %22 : vector<16xf32> to vector<16x1xf32>
    %24 = vector.broadcast %23 : vector<16x1xf32> to vector<16x12xf32>
    %25 = arith.subf %21, %24 : vector<16x12xf32>
    %26 = math.exp %25 : vector<16x12xf32>
    %27 = arith.truncf %26 : vector<16x12xf32> to vector<16x12xbf16>
    %cst_19 = arith.constant dense<0.000000e+00> : vector<16x12xf32>
    %28 = tpu.matmul %27, %1, %cst_19 {dimension_numbers = #tpu.dot_dimension_numbers<[1], [0], [0], [1], [0, 0, 1, 1], [], []>} : vector<16x12xbf16>, vector<12x12xbf16>, vector<16x12xf32> -> vector<16x12xf32>
    %cst_20 = arith.constant 1.000000e-30 : f32
    %29 = vector.broadcast %cst_20 : f32 to vector<16x12xf32>
    %30 = arith.maximumf %28, %29 : vector<16x12xf32>
    %31 = tpu.reciprocal %30 {approx = true} : vector<16x12xf32> -> vector<16x12xf32>
    %32 = arith.mulf %26, %31 : vector<16x12xf32>
    %33 = arith.truncf %32 : vector<16x12xf32> to vector<16x12xbf16>
    %cst_21 = arith.constant dense<0.000000e+00> : vector<16x96xf32>
    %34 = tpu.matmul %33, %2, %cst_21 {dimension_numbers = #tpu.dot_dimension_numbers<[1], [0], [0], [1], [0, 0, 1, 1], [], []>} : vector<16x12xbf16>, vector<12x96xbf16>, vector<16x96xf32> -> vector<16x96xf32>
    %35 = arith.truncf %20 : vector<16x32xf32> to vector<16x32xbf16>
    %cst_22 = arith.constant dense<0.000000e+00> : vector<32x32xf32>
    %36 = tpu.matmul %3, %35, %cst_22 {dimension_numbers = #tpu.dot_dimension_numbers<[1], [0], [0], [1], [0, 0, 1, 1], [], []>} : vector<32x16xbf16>, vector<16x32xbf16>, vector<32x32xf32> -> vector<32x32xf32>
    %37 = vector.extract_strided_slice %34 {offsets = [0, 32], sizes = [16, 32], strides = [1, 1]} : vector<16x96xf32> to vector<16x32xf32>
    %38 = arith.mulf %37, %20 : vector<16x32xf32>
    %39 = vector.extract_strided_slice %34 {offsets = [0, 0], sizes = [16, 32], strides = [1, 1]} : vector<16x96xf32> to vector<16x32xf32>
    %40 = vector.extract_strided_slice %36 {offsets = [0, 0], sizes = [16, 32], strides = [1, 1]} : vector<32x32xf32> to vector<16x32xf32>
    %41 = arith.mulf %39, %40 : vector<16x32xf32>
    %42 = arith.addf %38, %41 : vector<16x32xf32>
    %43 = vector.extract_strided_slice %34 {offsets = [0, 64], sizes = [16, 32], strides = [1, 1]} : vector<16x96xf32> to vector<16x32xf32>
    %44 = vector.extract_strided_slice %36 {offsets = [16, 0], sizes = [16, 32], strides = [1, 1]} : vector<32x32xf32> to vector<16x32xf32>
    %45 = arith.mulf %43, %44 : vector<16x32xf32>
    %46 = arith.addf %42, %45 : vector<16x32xf32>
    %47 = arith.truncf %46 : vector<16x32xf32> to vector<16x32xbf16>
    %cst_23 = arith.constant dense<0.000000e+00> : vector<16x32xf32>
    %48 = tpu.matmul %47, %5, %cst_23 {dimension_numbers = #tpu.dot_dimension_numbers<[1], [0], [0], [1], [0, 0, 1, 1], [], []>} : vector<16x32xbf16>, vector<32x32xbf16>, vector<16x32xf32> -> vector<16x32xf32>
    %49 = vector.broadcast %9 : vector<1x32xf32> to vector<16x32xf32>
    %50 = arith.addf %48, %49 : vector<16x32xf32>
    %51 = arith.addf %0, %50 : vector<16x32xf32>
    %cst_24 = arith.constant dense<0.000000e+00> : vector<16xf32>
    %52 = vector.multi_reduction <add>, %51, %cst_24 [1] : vector<16x32xf32> to vector<16xf32>
    %53 = vector.shape_cast %52 : vector<16xf32> to vector<16x1xf32>
    %cst_25 = arith.constant 3.200000e+01 : f32
    %54 = vector.broadcast %cst_25 : f32 to vector<16x1xf32>
    %55 = arith.divf %53, %54 : vector<16x1xf32>
    %56 = vector.broadcast %55 : vector<16x1xf32> to vector<16x32xf32>
    %57 = arith.subf %51, %56 : vector<16x32xf32>
    %58 = arith.mulf %57, %57 : vector<16x32xf32>
    %cst_26 = arith.constant dense<0.000000e+00> : vector<16xf32>
    %59 = vector.multi_reduction <add>, %58, %cst_26 [1] : vector<16x32xf32> to vector<16xf32>
    %60 = vector.shape_cast %59 : vector<16xf32> to vector<16x1xf32>
    %cst_27 = arith.constant 3.200000e+01 : f32
    %61 = vector.broadcast %cst_27 : f32 to vector<16x1xf32>
    %62 = arith.divf %60, %61 : vector<16x1xf32>
    %63 = vector.broadcast %55 : vector<16x1xf32> to vector<16x32xf32>
    %64 = arith.subf %51, %63 : vector<16x32xf32>
    %cst_28 = arith.constant 9.99999996E-13 : f32
    %65 = vector.broadcast %cst_28 : f32 to vector<16x1xf32>
    %66 = arith.addf %62, %65 : vector<16x1xf32>
    %67 = math.rsqrt %66 : vector<16x1xf32>
    %68 = vector.broadcast %67 : vector<16x1xf32> to vector<16x32xf32>
    %69 = arith.mulf %64, %68 : vector<16x32xf32>
    %70 = vector.broadcast %10 : vector<1x32xf32> to vector<16x32xf32>
    %71 = arith.mulf %69, %70 : vector<16x32xf32>
    %72 = vector.broadcast %11 : vector<1x32xf32> to vector<16x32xf32>
    %73 = arith.addf %71, %72 : vector<16x32xf32>
    %74 = arith.truncf %73 : vector<16x32xf32> to vector<16x32xbf16>
    %cst_29 = arith.constant dense<0.000000e+00> : vector<16x64xf32>
    %75 = tpu.matmul %74, %6, %cst_29 {dimension_numbers = #tpu.dot_dimension_numbers<[1], [0], [0], [1], [0, 0, 1, 1], [], []>} : vector<16x32xbf16>, vector<32x64xbf16>, vector<16x64xf32> -> vector<16x64xf32>
    %76 = vector.broadcast %12 : vector<1x64xf32> to vector<16x64xf32>
    %77 = arith.addf %75, %76 : vector<16x64xf32>
    %cst_30 = arith.constant 5.000000e-01 : f32
    %78 = vector.broadcast %cst_30 : f32 to vector<16x64xf32>
    %79 = arith.mulf %78, %77 : vector<16x64xf32>
    %cst_31 = arith.constant 4.471500e-02 : f32
    %80 = vector.broadcast %cst_31 : f32 to vector<16x64xf32>
    %81 = arith.mulf %80, %77 : vector<16x64xf32>
    %82 = arith.mulf %81, %77 : vector<16x64xf32>
    %83 = arith.mulf %82, %77 : vector<16x64xf32>
    %84 = arith.addf %77, %83 : vector<16x64xf32>
    %cst_32 = arith.constant 0.797884583 : f32
    %85 = vector.broadcast %cst_32 : f32 to vector<16x64xf32>
    %86 = arith.mulf %85, %84 : vector<16x64xf32>
    %87 = math.tanh %86 : vector<16x64xf32>
    %cst_33 = arith.constant 1.000000e+00 : f32
    %88 = vector.broadcast %cst_33 : f32 to vector<16x64xf32>
    %89 = arith.addf %88, %87 : vector<16x64xf32>
    %90 = arith.mulf %79, %89 : vector<16x64xf32>
    %91 = arith.truncf %90 : vector<16x64xf32> to vector<16x64xbf16>
    %cst_34 = arith.constant dense<0.000000e+00> : vector<16x32xf32>
    %92 = tpu.matmul %91, %7, %cst_34 {dimension_numbers = #tpu.dot_dimension_numbers<[1], [0], [0], [1], [0, 0, 1, 1], [], []>} : vector<16x64xbf16>, vector<64x32xbf16>, vector<16x32xf32> -> vector<16x32xf32>
    %93 = vector.broadcast %13 : vector<1x32xf32> to vector<16x32xf32>
    %94 = arith.addf %92, %93 : vector<16x32xf32>
    %95 = arith.addf %94, %73 : vector<16x32xf32>
    %cst_35 = arith.constant dense<0.000000e+00> : vector<16xf32>
    %96 = vector.multi_reduction <add>, %95, %cst_35 [1] : vector<16x32xf32> to vector<16xf32>
    %97 = vector.shape_cast %96 : vector<16xf32> to vector<16x1xf32>
    %cst_36 = arith.constant 3.200000e+01 : f32
    %98 = vector.broadcast %cst_36 : f32 to vector<16x1xf32>
    %99 = arith.divf %97, %98 : vector<16x1xf32>
    %100 = vector.broadcast %99 : vector<16x1xf32> to vector<16x32xf32>
    %101 = arith.subf %95, %100 : vector<16x32xf32>
    %102 = arith.mulf %101, %101 : vector<16x32xf32>
    %cst_37 = arith.constant dense<0.000000e+00> : vector<16xf32>
    %103 = vector.multi_reduction <add>, %102, %cst_37 [1] : vector<16x32xf32> to vector<16xf32>
    %104 = vector.shape_cast %103 : vector<16xf32> to vector<16x1xf32>
    %cst_38 = arith.constant 3.200000e+01 : f32
    %105 = vector.broadcast %cst_38 : f32 to vector<16x1xf32>
    %106 = arith.divf %104, %105 : vector<16x1xf32>
    %107 = vector.broadcast %99 : vector<16x1xf32> to vector<16x32xf32>
    %108 = arith.subf %95, %107 : vector<16x32xf32>
    %cst_39 = arith.constant 9.99999996E-13 : f32
    %109 = vector.broadcast %cst_39 : f32 to vector<16x1xf32>
    %110 = arith.addf %106, %109 : vector<16x1xf32>
    %111 = math.rsqrt %110 : vector<16x1xf32>
    %112 = vector.broadcast %111 : vector<16x1xf32> to vector<16x32xf32>
    %113 = arith.mulf %108, %112 : vector<16x32xf32>
    %114 = vector.broadcast %14 : vector<1x32xf32> to vector<16x32xf32>
    %115 = arith.mulf %113, %114 : vector<16x32xf32>
    %116 = vector.broadcast %15 : vector<1x32xf32> to vector<16x32xf32>
    %117 = arith.addf %115, %116 : vector<16x32xf32>
    %c224 = arith.constant 224 : index
    %c0_40 = arith.constant 0 : index
    %118 = vector.load %arg2[%c224, %c0_40] : memref<384x128xbf16, #tpu.memory_space<vmem>>, vector<32x44xbf16>
    %c256 = arith.constant 256 : index
    %c0_41 = arith.constant 0 : index
    %119 = vector.load %arg2[%c256, %c0_41] : memref<384x128xbf16, #tpu.memory_space<vmem>>, vector<32x32xbf16>
    %c288 = arith.constant 288 : index
    %c0_42 = arith.constant 0 : index
    %120 = vector.load %arg2[%c288, %c0_42] : memref<384x128xbf16, #tpu.memory_space<vmem>>, vector<32x64xbf16>
    %c320 = arith.constant 320 : index
    %c0_43 = arith.constant 0 : index
    %121 = vector.load %arg2[%c320, %c0_43] : memref<384x128xbf16, #tpu.memory_space<vmem>>, vector<64x32xbf16>
    %c8 = arith.constant 8 : index
    %c0_44 = arith.constant 0 : index
    %122 = vector.load %arg3[%c8, %c0_44] : memref<16x128xf32, #tpu.memory_space<vmem>>, vector<1x44xf32>
    %c9 = arith.constant 9 : index
    %c0_45 = arith.constant 0 : index
    %123 = vector.load %arg3[%c9, %c0_45] : memref<16x128xf32, #tpu.memory_space<vmem>>, vector<1x32xf32>
    %c10 = arith.constant 10 : index
    %c0_46 = arith.constant 0 : index
    %124 = vector.load %arg3[%c10, %c0_46] : memref<16x128xf32, #tpu.memory_space<vmem>>, vector<1x32xf32>
    %c11 = arith.constant 11 : index
    %c0_47 = arith.constant 0 : index
    %125 = vector.load %arg3[%c11, %c0_47] : memref<16x128xf32, #tpu.memory_space<vmem>>, vector<1x32xf32>
    %c12 = arith.constant 12 : index
    %c0_48 = arith.constant 0 : index
    %126 = vector.load %arg3[%c12, %c0_48] : memref<16x128xf32, #tpu.memory_space<vmem>>, vector<1x64xf32>
    %c13 = arith.constant 13 : index
    %c0_49 = arith.constant 0 : index
    %127 = vector.load %arg3[%c13, %c0_49] : memref<16x128xf32, #tpu.memory_space<vmem>>, vector<1x32xf32>
    %c14 = arith.constant 14 : index
    %c0_50 = arith.constant 0 : index
    %128 = vector.load %arg3[%c14, %c0_50] : memref<16x128xf32, #tpu.memory_space<vmem>>, vector<1x32xf32>
    %c15 = arith.constant 15 : index
    %c0_51 = arith.constant 0 : index
    %129 = vector.load %arg3[%c15, %c0_51] : memref<16x128xf32, #tpu.memory_space<vmem>>, vector<1x32xf32>
    %130 = arith.truncf %117 : vector<16x32xf32> to vector<16x32xbf16>
    %cst_52 = arith.constant dense<0.000000e+00> : vector<16x44xf32>
    %131 = tpu.matmul %130, %118, %cst_52 {dimension_numbers = #tpu.dot_dimension_numbers<[1], [0], [0], [1], [0, 0, 1, 1], [], []>} : vector<16x32xbf16>, vector<32x44xbf16>, vector<16x44xf32> -> vector<16x44xf32>
    %132 = vector.broadcast %122 : vector<1x44xf32> to vector<16x44xf32>
    %133 = arith.addf %131, %132 : vector<16x44xf32>
    %134 = vector.extract_strided_slice %133 {offsets = [0, 0], sizes = [16, 32], strides = [1, 1]} : vector<16x44xf32> to vector<16x32xf32>
    %135 = vector.extract_strided_slice %133 {offsets = [0, 32], sizes = [16, 12], strides = [1, 1]} : vector<16x44xf32> to vector<16x12xf32>
    %cst_53 = arith.constant dense<0xFF800000> : vector<16xf32>
    %136 = vector.multi_reduction <maximumf>, %135, %cst_53 [1] : vector<16x12xf32> to vector<16xf32>
    %137 = vector.shape_cast %136 : vector<16xf32> to vector<16x1xf32>
    %138 = vector.broadcast %137 : vector<16x1xf32> to vector<16x12xf32>
    %139 = arith.subf %135, %138 : vector<16x12xf32>
    %140 = math.exp %139 : vector<16x12xf32>
    %141 = arith.truncf %140 : vector<16x12xf32> to vector<16x12xbf16>
    %cst_54 = arith.constant dense<0.000000e+00> : vector<16x12xf32>
    %142 = tpu.matmul %141, %1, %cst_54 {dimension_numbers = #tpu.dot_dimension_numbers<[1], [0], [0], [1], [0, 0, 1, 1], [], []>} : vector<16x12xbf16>, vector<12x12xbf16>, vector<16x12xf32> -> vector<16x12xf32>
    %cst_55 = arith.constant 1.000000e-30 : f32
    %143 = vector.broadcast %cst_55 : f32 to vector<16x12xf32>
    %144 = arith.maximumf %142, %143 : vector<16x12xf32>
    %145 = tpu.reciprocal %144 {approx = true} : vector<16x12xf32> -> vector<16x12xf32>
    %146 = arith.mulf %140, %145 : vector<16x12xf32>
    %147 = arith.truncf %146 : vector<16x12xf32> to vector<16x12xbf16>
    %cst_56 = arith.constant dense<0.000000e+00> : vector<16x96xf32>
    %148 = tpu.matmul %147, %2, %cst_56 {dimension_numbers = #tpu.dot_dimension_numbers<[1], [0], [0], [1], [0, 0, 1, 1], [], []>} : vector<16x12xbf16>, vector<12x96xbf16>, vector<16x96xf32> -> vector<16x96xf32>
    %149 = arith.truncf %134 : vector<16x32xf32> to vector<16x32xbf16>
    %cst_57 = arith.constant dense<0.000000e+00> : vector<32x32xf32>
    %150 = tpu.matmul %3, %149, %cst_57 {dimension_numbers = #tpu.dot_dimension_numbers<[1], [0], [0], [1], [0, 0, 1, 1], [], []>} : vector<32x16xbf16>, vector<16x32xbf16>, vector<32x32xf32> -> vector<32x32xf32>
    %151 = vector.extract_strided_slice %148 {offsets = [0, 32], sizes = [16, 32], strides = [1, 1]} : vector<16x96xf32> to vector<16x32xf32>
    %152 = arith.mulf %151, %134 : vector<16x32xf32>
    %153 = vector.extract_strided_slice %148 {offsets = [0, 0], sizes = [16, 32], strides = [1, 1]} : vector<16x96xf32> to vector<16x32xf32>
    %154 = vector.extract_strided_slice %150 {offsets = [0, 0], sizes = [16, 32], strides = [1, 1]} : vector<32x32xf32> to vector<16x32xf32>
    %155 = arith.mulf %153, %154 : vector<16x32xf32>
    %156 = arith.addf %152, %155 : vector<16x32xf32>
    %157 = vector.extract_strided_slice %148 {offsets = [0, 64], sizes = [16, 32], strides = [1, 1]} : vector<16x96xf32> to vector<16x32xf32>
    %158 = vector.extract_strided_slice %150 {offsets = [16, 0], sizes = [16, 32], strides = [1, 1]} : vector<32x32xf32> to vector<16x32xf32>
    %159 = arith.mulf %157, %158 : vector<16x32xf32>
    %160 = arith.addf %156, %159 : vector<16x32xf32>
    %161 = arith.truncf %160 : vector<16x32xf32> to vector<16x32xbf16>
    %cst_58 = arith.constant dense<0.000000e+00> : vector<16x32xf32>
    %162 = tpu.matmul %161, %119, %cst_58 {dimension_numbers = #tpu.dot_dimension_numbers<[1], [0], [0], [1], [0, 0, 1, 1], [], []>} : vector<16x32xbf16>, vector<32x32xbf16>, vector<16x32xf32> -> vector<16x32xf32>
    %163 = vector.broadcast %123 : vector<1x32xf32> to vector<16x32xf32>
    %164 = arith.addf %162, %163 : vector<16x32xf32>
    %165 = arith.addf %117, %164 : vector<16x32xf32>
    %cst_59 = arith.constant dense<0.000000e+00> : vector<16xf32>
    %166 = vector.multi_reduction <add>, %165, %cst_59 [1] : vector<16x32xf32> to vector<16xf32>
    %167 = vector.shape_cast %166 : vector<16xf32> to vector<16x1xf32>
    %cst_60 = arith.constant 3.200000e+01 : f32
    %168 = vector.broadcast %cst_60 : f32 to vector<16x1xf32>
    %169 = arith.divf %167, %168 : vector<16x1xf32>
    %170 = vector.broadcast %169 : vector<16x1xf32> to vector<16x32xf32>
    %171 = arith.subf %165, %170 : vector<16x32xf32>
    %172 = arith.mulf %171, %171 : vector<16x32xf32>
    %cst_61 = arith.constant dense<0.000000e+00> : vector<16xf32>
    %173 = vector.multi_reduction <add>, %172, %cst_61 [1] : vector<16x32xf32> to vector<16xf32>
    %174 = vector.shape_cast %173 : vector<16xf32> to vector<16x1xf32>
    %cst_62 = arith.constant 3.200000e+01 : f32
    %175 = vector.broadcast %cst_62 : f32 to vector<16x1xf32>
    %176 = arith.divf %174, %175 : vector<16x1xf32>
    %177 = vector.broadcast %169 : vector<16x1xf32> to vector<16x32xf32>
    %178 = arith.subf %165, %177 : vector<16x32xf32>
    %cst_63 = arith.constant 9.99999996E-13 : f32
    %179 = vector.broadcast %cst_63 : f32 to vector<16x1xf32>
    %180 = arith.addf %176, %179 : vector<16x1xf32>
    %181 = math.rsqrt %180 : vector<16x1xf32>
    %182 = vector.broadcast %181 : vector<16x1xf32> to vector<16x32xf32>
    %183 = arith.mulf %178, %182 : vector<16x32xf32>
    %184 = vector.broadcast %124 : vector<1x32xf32> to vector<16x32xf32>
    %185 = arith.mulf %183, %184 : vector<16x32xf32>
    %186 = vector.broadcast %125 : vector<1x32xf32> to vector<16x32xf32>
    %187 = arith.addf %185, %186 : vector<16x32xf32>
    %188 = arith.truncf %187 : vector<16x32xf32> to vector<16x32xbf16>
    %cst_64 = arith.constant dense<0.000000e+00> : vector<16x64xf32>
    %189 = tpu.matmul %188, %120, %cst_64 {dimension_numbers = #tpu.dot_dimension_numbers<[1], [0], [0], [1], [0, 0, 1, 1], [], []>} : vector<16x32xbf16>, vector<32x64xbf16>, vector<16x64xf32> -> vector<16x64xf32>
    %190 = vector.broadcast %126 : vector<1x64xf32> to vector<16x64xf32>
    %191 = arith.addf %189, %190 : vector<16x64xf32>
    %cst_65 = arith.constant 5.000000e-01 : f32
    %192 = vector.broadcast %cst_65 : f32 to vector<16x64xf32>
    %193 = arith.mulf %192, %191 : vector<16x64xf32>
    %cst_66 = arith.constant 4.471500e-02 : f32
    %194 = vector.broadcast %cst_66 : f32 to vector<16x64xf32>
    %195 = arith.mulf %194, %191 : vector<16x64xf32>
    %196 = arith.mulf %195, %191 : vector<16x64xf32>
    %197 = arith.mulf %196, %191 : vector<16x64xf32>
    %198 = arith.addf %191, %197 : vector<16x64xf32>
    %cst_67 = arith.constant 0.797884583 : f32
    %199 = vector.broadcast %cst_67 : f32 to vector<16x64xf32>
    %200 = arith.mulf %199, %198 : vector<16x64xf32>
    %201 = math.tanh %200 : vector<16x64xf32>
    %cst_68 = arith.constant 1.000000e+00 : f32
    %202 = vector.broadcast %cst_68 : f32 to vector<16x64xf32>
    %203 = arith.addf %202, %201 : vector<16x64xf32>
    %204 = arith.mulf %193, %203 : vector<16x64xf32>
    %205 = arith.truncf %204 : vector<16x64xf32> to vector<16x64xbf16>
    %cst_69 = arith.constant dense<0.000000e+00> : vector<16x32xf32>
    %206 = tpu.matmul %205, %121, %cst_69 {dimension_numbers = #tpu.dot_dimension_numbers<[1], [0], [0], [1], [0, 0, 1, 1], [], []>} : vector<16x64xbf16>, vector<64x32xbf16>, vector<16x32xf32> -> vector<16x32xf32>
    %207 = vector.broadcast %127 : vector<1x32xf32> to vector<16x32xf32>
    %208 = arith.addf %206, %207 : vector<16x32xf32>
    %209 = arith.addf %208, %187 : vector<16x32xf32>
    %cst_70 = arith.constant dense<0.000000e+00> : vector<16xf32>
    %210 = vector.multi_reduction <add>, %209, %cst_70 [1] : vector<16x32xf32> to vector<16xf32>
    %211 = vector.shape_cast %210 : vector<16xf32> to vector<16x1xf32>
    %cst_71 = arith.constant 3.200000e+01 : f32
    %212 = vector.broadcast %cst_71 : f32 to vector<16x1xf32>
    %213 = arith.divf %211, %212 : vector<16x1xf32>
    %214 = vector.broadcast %213 : vector<16x1xf32> to vector<16x32xf32>
    %215 = arith.subf %209, %214 : vector<16x32xf32>
    %216 = arith.mulf %215, %215 : vector<16x32xf32>
    %cst_72 = arith.constant dense<0.000000e+00> : vector<16xf32>
    %217 = vector.multi_reduction <add>, %216, %cst_72 [1] : vector<16x32xf32> to vector<16xf32>
    %218 = vector.shape_cast %217 : vector<16xf32> to vector<16x1xf32>
    %cst_73 = arith.constant 3.200000e+01 : f32
    %219 = vector.broadcast %cst_73 : f32 to vector<16x1xf32>
    %220 = arith.divf %218, %219 : vector<16x1xf32>
    %221 = vector.broadcast %213 : vector<16x1xf32> to vector<16x32xf32>
    %222 = arith.subf %209, %221 : vector<16x32xf32>
    %cst_74 = arith.constant 9.99999996E-13 : f32
    %223 = vector.broadcast %cst_74 : f32 to vector<16x1xf32>
    %224 = arith.addf %220, %223 : vector<16x1xf32>
    %225 = math.rsqrt %224 : vector<16x1xf32>
    %226 = vector.broadcast %225 : vector<16x1xf32> to vector<16x32xf32>
    %227 = arith.mulf %222, %226 : vector<16x32xf32>
    %228 = vector.broadcast %128 : vector<1x32xf32> to vector<16x32xf32>
    %229 = arith.mulf %227, %228 : vector<16x32xf32>
    %230 = vector.broadcast %129 : vector<1x32xf32> to vector<16x32xf32>
    %231 = arith.addf %229, %230 : vector<16x32xf32>
    %c0_75 = arith.constant 0 : index
    %c0_76 = arith.constant 0 : index
    %232 = vector.load %arg4[%c0_75, %c0_76] : memref<16x32xf32, #tpu.memory_space<vmem>>, vector<16x32xf32>
    tpu.vector_store %arg4[%c0_75, %c0_76], %231 {strides = array<i32>} : memref<16x32xf32, #tpu.memory_space<vmem>>, vector<16x32xf32>,
    return
  }
  func.func @transform_0(%arg0: i32) -> (i32, i32) {
    %c0_i32 = arith.constant 0 : i32
    %c0_i32_0 = arith.constant 0 : i32
    %c0_i32_1 = arith.constant 0 : i32
    return %c0_i32, %c0_i32_0 : i32, i32
  }
  func.func @transform_1(%arg0: i32) -> (i32, i32) {
    %c0_i32 = arith.constant 0 : i32
    %c0_i32_0 = arith.constant 0 : i32
    %c0_i32_1 = arith.constant 0 : i32
    return %c0_i32, %c0_i32_0 : i32, i32
  }
  func.func @transform_2(%arg0: i32) -> (i32, i32) {
    %c0_i32 = arith.constant 0 : i32
    %c0_i32_0 = arith.constant 0 : i32
    %c0_i32_1 = arith.constant 0 : i32
    return %c0_i32, %c0_i32_0 : i32, i32
  }
  func.func @transform_3(%arg0: i32) -> (i32, i32) {
    %c0_i32 = arith.constant 0 : i32
    %c0_i32_0 = arith.constant 0 : i32
    %c0_i32_1 = arith.constant 0 : i32
    return %c0_i32, %c0_i32_0 : i32, i32
  }
}

</mosaic_0001>

<bundles_post_ra>
// kernel: tpu_custom_call.1
= control target key start
LH: loop header
LB: loop body
LE: loop exit
PB: predicated region body
PF: predicated region fallthrough
CT: control target
= control target key end

     0   :  { %8 = vsyncpa [#allocation3], 0  ;;  %s1893_s0 = inlined_call_operand.hbm [shape: f32[16,32], index: 0, kind: input, shape index: {}]   ;;  %s1894_s1 = inlined_call_operand.hbm [shape: bf16[384,128], index: 1, kind: input, shape index: {}]   ;;  %s1895_s2 = inlined_call_operand.hbm [shape: f32[16,128], index: 2, kind: input, shape index: {}]   ;;  %s1896_s3 = inlined_call_operand.hbm [shape: f32[16,32], index: 3, kind: output, shape index: {}]  }
   0x1   :  { %9 = vsyncpa [#allocation6], 0 }
   0x2   :  { %10 = vsyncpa [#allocation4], 0  ;;  %s1692_s12 = smov [#allocation5]  }
   0x3   :  { %s28_s13 = sshll.u32 %s1692_s12, 4  ;;  %s29_s13 = int_to_ptr.vmem [resolvable:$true] %s28_s13 }
   0x4   :  { %s1614_s14 = scalar_lea.vmem %s29_s13, 3072  ;;  %p1619_p1 = scmp.lt.s32.totalorder %s29_s13, %s29_s13 }
   0x5   :  { %p1615_p0 = scmp.ne.s32.totalorder %s29_s13, %s1614_s14  ;;  %p1620_p2 = scmp.lt.s32.totalorder %s1614_s14, %s1614_s14 }
   0x7   :  { %p1621_p3 = por %p1620_p2, %p1619_p1 }
   0x9   :  { %p1622_p4 = pnand %p1621_p3, %p1615_p0 }
   0xb   :  { %1625 = shalt.err (!%p1622_p4)
}
   0xc   :  { %s1693_s15 = smov 64   ;;  %s1694_s16 = smov 4  }
   0xd   :  { %34 = dma.hbm_to_vmem [thread:$0]  %s1894_s1, 3072, %s29_s13, [#allocation6], %s1693_s15, %s1693_s15, %s1694_s16  }
   0xe   :  { %s1695_s19 = smov [#allocation2]  }
   0xf   :  { %s16_s20 = sshll.u32 %s1695_s19, 4  ;;  %s17_s20 = int_to_ptr.vmem [resolvable:$true] %s16_s20 }
  0x10   :  { %s1634_s21 = scalar_lea.vmem %s17_s20, 256  ;;  %p1639_p6 = scmp.lt.s32.totalorder %s17_s20, %s17_s20 }
  0x11   :  { %p1635_p5 = scmp.ne.s32.totalorder %s17_s20, %s1634_s21  ;;  %p1640_p7 = scmp.lt.s32.totalorder %s1634_s21, %s1634_s21 }
  0x13   :  { %p1641_p8 = por %p1640_p7, %p1639_p6 }
  0x15   :  { %p1642_p9 = pnand %p1641_p8, %p1635_p5 }
  0x17   :  { %1645 = shalt.err (!%p1642_p9)
}
  0x18   :  { %s1696_s22 = smov 128   ;;  %s1697_s23 = smov 8  }
  0x19   :  { %22 = dma.hbm_to_vmem [thread:$0]  %s1893_s0, 256, %s17_s20, [#allocation3], %s1696_s22, %s1696_s22, %s1697_s23  }
  0x1a   :  { %s1698_s1 = smov [#allocation7]  }
  0x1b   :  { %s40_s26 = sshll.u32 %s1698_s1, 4  ;;  %s41_s26 = int_to_ptr.vmem [resolvable:$true] %s40_s26 }
  0x1c   :  { %s1654_s27 = scalar_lea.vmem %s41_s26, 256  ;;  %p1659_p11 = scmp.lt.s32.totalorder %s41_s26, %s41_s26 }
  0x1d   :  { %p1655_p10 = scmp.ne.s32.totalorder %s41_s26, %s1654_s27  ;;  %p1660_p12 = scmp.lt.s32.totalorder %s1654_s27, %s1654_s27 }
  0x1f   :  { %p1661_p13 = por %p1660_p12, %p1659_p11 }
  0x21   :  { %p1662_p0 = pnand %p1661_p13, %p1655_p10 }
  0x23   :  { %1665 = shalt.err (!%p1662_p0)
}
  0x24   :  { %46 = dma.hbm_to_vmem [thread:$0]  %s1895_s2, 256, %s41_s26, [#allocation6], %s1696_s22, %s1696_s22, %s1697_s23  }
  0x25   :  { %1686 = dma.done.wait [#allocation3], 256  }
  0x26   :  { %1687 = vsyncadd [#allocation3], 4294967040 }
  0x27   :  { %1688 = dma.done.wait [#allocation6], 3328  }
  0x28   :  { %1689 = vsyncadd [#allocation6], 4294963968  ;;  %v1699_v0 = vmov 0.0   ;;  %vm1700_vm0 = vmmov 0   ;;  %v1542_v1 = vld [vmem:[#allocation5 + $0x28] sm:$0xff]   ;;  %v1543_v2 = vld [vmem:[#allocation5 + $0x20] sm:$0xff]  }
  0x29   :  { %1422 = vmatprep.subr.bf16.mxu0 %v1699_v0  ;;  %1426 = vmatprep.mubr.msk.bf16.mxu0 %vm1700_vm0, %v1699_v0  ;;  %v1747_v3 = vld [vmem:[#allocation2] sm:$0xff]  ;;  %v1749_v4 = vld [vmem:[#allocation2 + $0x8] sm:$0xff]  ;;  %vm112_vm1 = vcmask 261120   ;;  %v1544_v6 = vld [vmem:[#allocation5] sm:$0x3f]   ;;  %vm183_vm2 = vcmask 1045504  }
  0x2a   :  { %1436 = vmatprep.subr.bf16.mxu1 %v1699_v0  ;;  %1438 = vmatprep.mubr.msk.bf16.mxu1 %vm1700_vm0, %v1699_v0  ;;  %v95_v5 = vpack.c.bf16 %v1749_v4, %v1747_v3  ;;  %v1759_v7 = vsel %vm183_vm2, %v1544_v6, 0  ;;  %v1324_v8 = vld [vmem:[#allocation7] ss:$0 sm:$0xff]  ;;  %vm157_vm3 = vcmask 359680   ;;  %s1701_s0 = smov 96   ;;  %vm179_vm4 = vcmask 97280  }
  0x2b   :  { %1423 = vmatpush3.bf16.msra.mxu0 %v1542_v1  ;;  %v1765_v27 = vld [vmem:[#allocation5 + $0x10] sm:$0xff]   ;;  %vm309_vm5 = vcmask 130048   ;;  %v1771_v29 = vld [vmem:[#allocation5 + $0x18] sm:$0xff]   ;;  %s1702_s2 = smov 32   ;;  %v1547_v38 = vld [vmem:[#allocation5 + $0x8] sm:$0x3f]  }
  0x2c   :  { %1424 = vmatprep.subr.bf16.mxu0 %v1699_v0  ;;  %v1780_v39 = vsel %vm183_vm2, %v1547_v38, 0  ;;  %v1548_v53 = vld [vmem:[#allocation5 + $0x38] sm:$0xff]   ;;  %v1549_v56 = vld [vmem:[#allocation5 + $0x30] sm:$0xff]   ;;  %v1550_v38 = vld [vmem:[#allocation5 + $0x48] sm:$0xff]   ;;  %vm620_vm6 = vcmask 523264   ;;  %s1703_s30 = smov [#allocation8]  }
  0x2d   :  { %1437 = vmatpush3.bf16.msra.mxu1 %v1780_v39  ;;  %s1311_s4 = sshll.u32 %s1703_s30, 4  ;;  %s1312_s4 = int_to_ptr.vmem [resolvable:$true] %s1311_s4 }
  0x2e   :  { %1448 = vmatprep.subr.bf16.mxu1 %v1699_v0  ;;  %s1666_s5 = scalar_lea.vmem %s1312_s4, 256  ;;  %p1671_p2 = scmp.lt.s32.totalorder %s1312_s4, %s1312_s4 }
  0x2f   :  { %1425 = vmatpush3.bf16.msra.mxu0 %v1543_v2  ;;  %p1667_p1 = scmp.ne.s32.totalorder %s1312_s4, %s1666_s5  ;;  %p1672_p3 = scmp.lt.s32.totalorder %s1666_s5, %s1666_s5 }
  0x30   :  { %1430 = vmatprep.subr.bf16.mxu0 %v1699_v0 }
  0x31   :  { %p1673_p4 = por %p1672_p3, %p1671_p2 }
  0x32   :  { %1427 = vmatmul.mubr.msk.bf16.vlgmr.msra.gmra.mxu0 %vm112_vm1, %v95_v5 }
  0x33   :  { %1432 = vmatprep.mubr.msk.bf16.mxu0 %vm1700_vm0, %v1699_v0  ;;  %1431 = vmatpush3.bf16.msra.mxu0 %v1759_v7  ;;  %p1674_p5 = pnand %p1673_p4, %p1667_p1 }
  0xf2   :  { %v150_v9 = vpop.f32.mrf.mxu0 }
  0xf3   :  { %v151_v10 = vadd.f32 %v1324_v8, %v150_v9 }
  0xf4   :  { %v1428_v11 = vpop.f32.mrf.mxu0 }
  0xf5   :  { %v158_v12 = vsel %vm157_vm3, %v151_v10, -inf }
  0xf6   :  { %159 = vmax.xlane.f32.xlu0 %v158_v12  ;;  %v153_v13 = vpop.f32.mrf.mxu0 }
  0xf7   :  { %v154_v14 = vadd.f32 %v1324_v8, %v153_v13 }
  0xf8   :  { %v1429_v15 = vpop.f32.mrf.mxu0 }
  0xf9   :  { %v161_v16 = vsel %vm157_vm3, %v154_v14, -inf  ;;  %v298_v17 = vpack.c.bf16 %v154_v14, %v151_v10 }
  0xfa   :  { %162 = vmax.xlane.f32.xlu0 %v161_v16  ;;  %v1336_v16 = vld [vmem:[#allocation7 + $0x1] ss:$0 sm:$0xff] }
  0xfb   :  { %1442 = vmatprep.subr.bf16.mxu0 %v298_v17 }
 0x17f   :  { %v160_v18 = vpop.xlane.xlu0 %159 }
 0x180   :  { %v164_v19 = vsub.f32 %v151_v10, %v160_v18 }
 0x182   :  { %v166_v20 = vmul.f32 1.442695, %v164_v19 }
 0x183   :  { %v163_v21 = vpop.xlane.xlu0 %162 }
 0x184   :  { %v165_v22 = vsub.f32 %v154_v14, %v163_v21  ;;  %1566 = vpow2.f32 %v166_v20 }
 0x186   :  { %v168_v23 = vmul.f32 1.442695, %v165_v22 }
 0x188   :  { %1568 = vpow2.f32 %v168_v23 }
 0x191   :  { %v1567_v24 = vpop.eup %1566 }
 0x195   :  { %v1569_v25 = vpop.eup %1568 }
 0x196   :  { %v170_v26 = vpack.c.bf16 %v1569_v25, %v1567_v24 }
 0x198   :  { %172 = vrot.lane.b32.xlu1 %v170_v26, %s1701_s0 }
 0x20a   :  { %v173_v28 = vpop.permute.xlu1 %172 }
 0x20b   :  { %1433 = vmatmul.mubr.msk.bf16.vlgmr.msra.gmra.mxu0 %vm179_vm4, %v173_v28 }
 0x20c   :  { %1443 = vmatpush3.bf16.msra.mxu0 %v298_v17  ;;  %1444 = vmatprep.mubr.msk.bf16.mxu0 %vm309_vm5, %v1765_v27 }
 0x20d   :  { %1456 = vmatprep.subr.bf16.mxu0 %v1699_v0 }
 0x213   :  { %1445 = vmatmul.mubr.msk.bf16.vlgmr.msra.gmra.mxu0 %vm309_vm5, %v1771_v29 }
 0x214   :  { %1460 = vmatprep.mubr.msk.bf16.mxu0 %vm1700_vm0, %v1699_v0  ;;  %1457 = vmatpush3.bf16.msra.mxu0 %v1550_v38 }
 0x215   :  { %1458 = vmatprep.subr.bf16.mxu0 %v1699_v0 }
 0x2cb   :  { %v221_v30 = vpop.f32.mrf.mxu0 }
 0x2cc   :  { %v228_v31 = vmax.f32 %v221_v30, 1e-30 }
 0x2cd   :  { %v1434_v32 = vpop.f32.mrf.mxu0 }
 0x2ce   :  { %1570 = vrcp.f32 %v228_v31 }
 0x2cf   :  { %v224_v33 = vpop.f32.mrf.mxu0 }
 0x2d0   :  { %v229_v34 = vmax.f32 %v224_v33, 1e-30 }
 0x2d1   :  { %v1435_v35 = vpop.f32.mrf.mxu0 }
 0x2d2   :  { %1572 = vrcp.f32 %v229_v34 }
 0x2d3   :  { %v1446_v44 = vpop.f32.mrf.mxu0 }
 0x2d5   :  { %v350_v46 = vpop.f32.mrf.mxu0 }
 0x2d7   :  { %v1447_v47 = vpop.f32.mrf.mxu0 }
 0x2d9   :  { %v353_v54 = vpop.f32.mrf.mxu0 }
 0x2db   :  { %v1571_v36 = vpop.eup %1570 }
 0x2dc   :  { %234 = vrot.lane.b32.xlu1 %v1571_v36, %s1702_s2 }
 0x2df   :  { %v1573_v37 = vpop.eup %1572 }
 0x2e0   :  { %236 = vrot.lane.b32.xlu0 %v1573_v37, %s1702_s2 }
 0x34e   :  { %v235_v40 = vpop.permute.xlu1 %234 }
 0x34f   :  { %v240_v42 = vmul.f32 %v1567_v24, %v235_v40 }
 0x352   :  { %v237_v41 = vpop.permute.xlu0 %236 }
 0x353   :  { %v241_v43 = vmul.f32 %v1569_v25, %v237_v41 }
 0x355   :  { %v242_v45 = vpack.c.bf16 %v241_v43, %v240_v42 }
 0x357   :  { %244 = vrot.lane.b32.xlu1 %v242_v45, %s1701_s0 }
 0x35b   :  { %389 = vrot.lane.b32.xlu1 %v1446_v44, %s1693_s15 }
 0x35f   :  { %391 = vrot.lane.b32.xlu1 %v1447_v47, %s1693_s15 }
 0x363   :  { %367 = vrot.lane.b32.xlu1 %v151_v10, %s1702_s2 }
 0x367   :  { %369 = vrot.lane.b32.xlu1 %v154_v14, %s1702_s2 }
 0x3c9   :  { %v245_v48 = vpop.permute.xlu1 %244 }
 0x3ca   :  { %1439 = vmatmul.mubr.msk.bf16.vlgmr.msra.gmra.mxu1 %vm179_vm4, %v245_v48  ;;  %v1340_v48 = vld [vmem:[#allocation7 + $0x2] ss:$0 sm:$0xff] }
 0x3cb   :  { %1452 = vmatprep.mubr.msk.bf16.mxu1 %vm1700_vm0, %v1699_v0  ;;  %1449 = vmatpush3.bf16.msra.mxu1 %v1548_v53 }
 0x3cc   :  { %1450 = vmatprep.subr.bf16.mxu1 %v1699_v0 }
 0x3cd   :  { %v390_v51 = vpop.permute.xlu1 %389 }
 0x3cf   :  { %1451 = vmatpush3.bf16.msra.mxu1 %v1549_v56 }
 0x3d0   :  { %1464 = vmatprep.subr.bf16.mxu1 %v1699_v0 }
 0x3d1   :  { %v392_v60 = vpop.permute.xlu1 %391 }
 0x3d5   :  { %v368_v62 = vpop.permute.xlu1 %367 }
 0x3d9   :  { %v370_v63 = vpop.permute.xlu1 %369 }
 0x48a   :  { %v291_v49 = vpop.f32.mrf.mxu1 }
 0x48b   :  { %v375_v50 = vmul.f32 %v350_v46, %v291_v49  ;;  %v395_v57 = vmul.f32 %v390_v51, %v291_v49  ;;  %v373_v5 = vmul.f32 %v368_v62, %v291_v49 }
 0x48c   :  { %v1440_v52 = vpop.f32.mrf.mxu1 }
 0x48d   :  { %379 = vrot.lane.b32.xlu1 %v375_v50, %s1702_s2  ;;  %v1341_v52 = vld [vmem:[#allocation7 + $0x3] ss:$0 sm:$0xff] }
 0x48e   :  { %v294_v55 = vpop.f32.mrf.mxu1 }
 0x48f   :  { %v376_v58 = vmul.f32 %v353_v54, %v294_v55  ;;  %v396_v61 = vmul.f32 %v392_v60, %v294_v55  ;;  %v374_v6 = vmul.f32 %v370_v63, %v294_v55  ;;  %v1555_v60 = vld [vmem:[#allocation5 + $0x50] sm:$0xff]  }
 0x490   :  { %v1441_v59 = vpop.f32.mrf.mxu1 }
 0x491   :  { %399 = vrot.lane.b32.xlu1 %v395_v57, %s1701_s0  ;;  %381 = vrot.lane.b32.xlu0 %v376_v58, %s1702_s2  ;;  %v1552_v57 = vld [vmem:[#allocation5 + $0x68] sm:$0xff]   ;;  %v1553_v58 = vld [vmem:[#allocation5 + $0x60] sm:$0xff]   ;;  %v1554_v59 = vld [vmem:[#allocation5 + $0x58] sm:$0xff]  }
 0x495   :  { %401 = vrot.lane.b32.xlu0 %v396_v61, %s1701_s0  ;;  %v1342_v61 = vld [vmem:[#allocation7 + $0x4] ss:$0 sm:$0xff] }
 0x4ff   :  { %v380_v1 = vpop.permute.xlu1 %379 }
 0x500   :  { %v385_v9 = vadd.f32 %v380_v1, %v373_v5 }
 0x503   :  { %v382_v2 = vpop.permute.xlu0 %381  ;;  %v400_v8 = vpop.permute.xlu1 %399 }
 0x504   :  { %v386_v10 = vadd.f32 %v382_v2, %v374_v6  ;;  %v405_v12 = vadd.f32 %v400_v8, %v385_v9 }
 0x507   :  { %v402_v11 = vpop.permute.xlu0 %401 }
 0x508   :  { %v406_v13 = vadd.f32 %v402_v11, %v386_v10 }
 0x50a   :  { %v407_v14 = vpack.c.bf16 %v406_v13, %v405_v12 }
 0x50c   :  { %413 = vrot.lane.b32.xlu1 %v407_v14, %s1701_s0 }
 0x57e   :  { %v414_v15 = vpop.permute.xlu1 %413 }
 0x57f   :  { %1453 = vmatmul.mubr.msk.bf16.vlgmr.msra.gmra.mxu1 %vm112_vm1, %v414_v15 }
 0x580   :  { %1472 = vmatprep.mubr.msk.bf16.mxu1 %vm1700_vm0, %v1699_v0  ;;  %1465 = vmatpush3.bf16.msra.mxu1 %v1552_v57 }
 0x581   :  { %1466 = vmatprep.subr.bf16.mxu1 %v1699_v0 }
 0x584   :  { %1467 = vmatpush3.bf16.msra.mxu1 %v1553_v58  ;;  %v1352_v58 = vld [vmem:[#allocation7 + $0x6] ss:$0 sm:$0xff] }
 0x585   :  { %1468 = vmatprep.subr.bf16.mxu1 %v1699_v0 }
 0x588   :  { %1469 = vmatpush3.bf16.msra.mxu1 %v1554_v59 }
 0x589   :  { %1470 = vmatprep.subr.bf16.mxu1 %v1699_v0 }
 0x58c   :  { %1471 = vmatpush3.bf16.msra.mxu1 %v1555_v60 }
 0x58d   :  { %1490 = vmatprep.subr.bf16.mxu1 %v1699_v0 }
 0x63f   :  { %v464_v17 = vpop.f32.mrf.mxu1 }
 0x640   :  { %v465_v18 = vadd.f32 %v1336_v16, %v464_v17 }
 0x641   :  { %v1454_v19 = vpop.f32.mrf.mxu1 }
 0x642   :  { %v471_v20 = vadd.f32 %v465_v18, %v1747_v3 }
 0x643   :  { %v467_v21 = vpop.f32.mrf.mxu1 }
 0x644   :  { %v468_v22 = vadd.f32 %v1336_v16, %v467_v21  ;;  %v473_v23 = vsel %vm112_vm1, %v471_v20, 0.0 }
 0x645   :  { %474 = vadd.xlane.f32.xlu0 %v473_v23  ;;  %v1455_v24 = vpop.f32.mrf.mxu1 }
 0x646   :  { %v472_v25 = vadd.f32 %v468_v22, %v1749_v4  ;;  %v1551_v4 = vld [vmem:[#allocation5 + $0x40] sm:$0xff]  }
 0x647   :  { %1459 = vmatpush3.bf16.msra.mxu0 %v1551_v4 }
 0x648   :  { %v476_v26 = vsel %vm112_vm1, %v472_v25, 0.0  ;;  %1476 = vmatprep.subr.bf16.mxu0 %v1699_v0 }
 0x649   :  { %477 = vadd.xlane.f32.xlu1 %v476_v26 }
 0x6ce   :  { %v475_v28 = vpop.xlane.xlu0 %474 }
 0x6cf   :  { %v480_v30 = vmul.f32 0.03125, %v475_v28  ;;  %v1346_v28 = vld [vmem:[#allocation7 + $0x5] ss:$0 sm:$0xff] }
 0x6d1   :  { %v482_v31 = vsub.f32 %v471_v20, %v480_v30 }
 0x6d2   :  { %v478_v32 = vpop.xlane.xlu1 %477 }
 0x6d3   :  { %v481_v33 = vmul.f32 0.03125, %v478_v32  ;;  %v484_v34 = vmul.f32 %v482_v31, %v482_v31 }
 0x6d5   :  { %v483_v35 = vsub.f32 %v472_v25, %v481_v33  ;;  %v486_v3 = vsel %vm112_vm1, %v484_v34, 0.0 }
 0x6d6   :  { %487 = vadd.xlane.f32.xlu0 %v486_v3 }
 0x6d7   :  { %v485_v36 = vmul.f32 %v483_v35, %v483_v35 }
 0x6d9   :  { %v489_v37 = vsel %vm112_vm1, %v485_v36, 0.0 }
 0x6da   :  { %490 = vadd.xlane.f32.xlu0 %v489_v37 }
 0x75f   :  { %v488_v40 = vpop.xlane.xlu0 %487 }
 0x760   :  { %v492_v41 = vmul.f32 0.03125, %v488_v40 }
 0x762   :  { %v494_v42 = vadd.f32 1e-12, %v492_v41 }
 0x763   :  { %v491_v43 = vpop.xlane.xlu0 %490 }
 0x764   :  { %1574 = vrsqrt.f32 %v494_v42  ;;  %v493_v44 = vmul.f32 0.03125, %v491_v43 }
 0x766   :  { %v495_v45 = vadd.f32 1e-12, %v493_v44 }
 0x768   :  { %1576 = vrsqrt.f32 %v495_v45 }
 0x771   :  { %v1575_v46 = vpop.eup %1574 }
 0x772   :  { %v498_v47 = vmul.f32 %v1575_v46, %v482_v31 }
 0x774   :  { %v504_v51 = vmul.f32 %v1340_v48, %v498_v47 }
 0x775   :  { %v1577_v49 = vpop.eup %1576 }
 0x776   :  { %v499_v50 = vmul.f32 %v1577_v49, %v483_v35  ;;  %v510_v54 = vadd.f32 %v1341_v52, %v504_v51  ;;  %v1557_v49 = vld [vmem:[#allocation5 + $0x70] sm:$0xff]  }
 0x778   :  { %v505_v53 = vmul.f32 %v1340_v48, %v499_v50  ;;  %v1556_v48 = vld [vmem:[#allocation5 + $0x78] sm:$0xff]  }
 0x77a   :  { %v511_v55 = vadd.f32 %v1341_v52, %v505_v53 }
 0x77c   :  { %v512_v56 = vpack.c.bf16 %v511_v55, %v510_v54 }
 0x77e   :  { %1461 = vmatmul.mubr.msk.bf16.vlgmr.msra.gmra.mxu0 %vm112_vm1, %v512_v56 }
 0x77f   :  { %1480 = vmatprep.mubr.msk.bf16.mxu0 %vm1700_vm0, %v1699_v0  ;;  %1477 = vmatpush3.bf16.msra.mxu0 %v1556_v48  ;;  %v1559_v48 = vld [vmem:[#allocation5 + $0x80] sm:$0xff]  }
 0x780   :  { %1478 = vmatprep.subr.bf16.mxu0 %v1699_v0 }
 0x783   :  { %1479 = vmatpush3.bf16.msra.mxu0 %v1557_v49 }
 0x784   :  { %1484 = vmatprep.subr.bf16.mxu0 %v1699_v0 }
 0x83e   :  { %v566_v62 = vpop.f32.mrf.mxu0 }
 0x83f   :  { %v567_v63 = vadd.f32 %v1342_v61, %v566_v62  ;;  %v1353_v62 = vld [vmem:[#allocation7 + $0x7] ss:$0 sm:$0xff] }
 0x840   :  { %v1462_v1 = vpop.f32.mrf.mxu0 }
 0x841   :  { %v575_v2 = vmul.f32 0.044715, %v567_v63  ;;  %v573_v21 = vmul.f32 0.5, %v567_v63 }
 0x842   :  { %v569_v5 = vpop.f32.mrf.mxu0 }
 0x843   :  { %v577_v6 = vmul.f32 %v575_v2, %v567_v63  ;;  %v570_v8 = vadd.f32 %v1342_v61, %v569_v5 }
 0x844   :  { %v1463_v9 = vpop.f32.mrf.mxu0 }
 0x845   :  { %v579_v10 = vmul.f32 %v577_v6, %v567_v63  ;;  %v576_v11 = vmul.f32 0.044715, %v570_v8  ;;  %v574_v22 = vmul.f32 0.5, %v570_v8  ;;  %v1354_v6 = vld [vmem:[#allocation7 + $0x8] ss:$0 sm:$0xff] }
 0x847   :  { %v581_v12 = vadd.f32 %v579_v10, %v567_v63  ;;  %v578_v13 = vmul.f32 %v576_v11, %v570_v8 }
 0x849   :  { %v583_v14 = vmul.f32 0.7978846, %v581_v12  ;;  %v580_v15 = vmul.f32 %v578_v13, %v570_v8 }
 0x84b   :  { %1578 = vtanh.f32 %v583_v14  ;;  %v582_v16 = vadd.f32 %v580_v15, %v570_v8 }
 0x84d   :  { %v584_v17 = vmul.f32 0.7978846, %v582_v16 }
 0x84f   :  { %1580 = vtanh.f32 %v584_v17 }
 0x858   :  { %v1579_v18 = vpop.eup %1578 }
 0x859   :  { %v587_v19 = vadd.f32 1.0, %v1579_v18 }
 0x85b   :  { %v589_v24 = vmul.f32 %v587_v19, %v573_v21 }
 0x85c   :  { %v1581_v20 = vpop.eup %1580 }
 0x85d   :  { %v588_v23 = vadd.f32 1.0, %v1581_v20 }
 0x85f   :  { %v590_v25 = vmul.f32 %v588_v23, %v574_v22 }
 0x861   :  { %v591_v26 = vpack.c.bf16 %v590_v25, %v589_v24 }
 0x863   :  { %1473 = vmatmul.mubr.msk.bf16.vlgmr.msra.gmra.mxu1 %vm620_vm6, %v591_v26 }
 0x864   :  { %1491 = vmatpush3.bf16.msra.mxu1 %v1780_v39  ;;  %1492 = vmatprep.mubr.msk.bf16.mxu1 %vm1700_vm0, %v1699_v0 }
 0x865   :  { %1502 = vmatprep.subr.bf16.mxu1 %v1699_v0 }
 0x923   :  { %v658_v30 = vpop.f32.mrf.mxu1 }
 0x924   :  { %v659_v31 = vadd.f32 %v1346_v28, %v658_v30 }
 0x925   :  { %v1474_v32 = vpop.f32.mrf.mxu1 }
 0x926   :  { %v665_v33 = vadd.f32 %v659_v31, %v510_v54 }
 0x927   :  { %v661_v34 = vpop.f32.mrf.mxu1 }
 0x928   :  { %v662_v35 = vadd.f32 %v1346_v28, %v661_v34  ;;  %v667_v3 = vsel %vm112_vm1, %v665_v33, 0.0 }
 0x929   :  { %668 = vadd.xlane.f32.xlu1 %v667_v3  ;;  %v1475_v36 = vpop.f32.mrf.mxu1 }
 0x92a   :  { %v666_v37 = vadd.f32 %v662_v35, %v511_v55 }
 0x92c   :  { %v670_v38 = vsel %vm112_vm1, %v666_v37, 0.0 }
 0x92d   :  { %671 = vadd.xlane.f32.xlu0 %v670_v38 }
 0x9b2   :  { %v669_v39 = vpop.xlane.xlu1 %668 }
 0x9b3   :  { %v673_v4 = vmul.f32 0.03125, %v669_v39 }
 0x9b5   :  { %v675_v40 = vsub.f32 %v665_v33, %v673_v4 }
 0x9b6   :  { %v672_v41 = vpop.xlane.xlu0 %671 }
 0x9b7   :  { %v674_v42 = vmul.f32 0.03125, %v672_v41  ;;  %v677_v43 = vmul.f32 %v675_v40, %v675_v40 }
 0x9b9   :  { %v676_v44 = vsub.f32 %v666_v37, %v674_v42  ;;  %v679_v45 = vsel %vm112_vm1, %v677_v43, 0.0 }
 0x9ba   :  { %680 = vadd.xlane.f32.xlu1 %v679_v45 }
 0x9bb   :  { %v678_v46 = vmul.f32 %v676_v44, %v676_v44 }
 0x9bd   :  { %v682_v47 = vsel %vm112_vm1, %v678_v46, 0.0 }
 0x9be   :  { %683 = vadd.xlane.f32.xlu0 %v682_v47 }
 0xa43   :  { %v681_v50 = vpop.xlane.xlu1 %680 }
 0xa44   :  { %v685_v51 = vmul.f32 0.03125, %v681_v50 }
 0xa46   :  { %v687_v52 = vadd.f32 1e-12, %v685_v51 }
 0xa47   :  { %v684_v53 = vpop.xlane.xlu0 %683 }
 0xa48   :  { %1582 = vrsqrt.f32 %v687_v52  ;;  %v686_v54 = vmul.f32 0.03125, %v684_v53 }
 0xa4a   :  { %v688_v55 = vadd.f32 1e-12, %v686_v54 }
 0xa4c   :  { %1584 = vrsqrt.f32 %v688_v55 }
 0xa55   :  { %v1583_v56 = vpop.eup %1582 }
 0xa56   :  { %v691_v57 = vmul.f32 %v1583_v56, %v675_v40 }
 0xa58   :  { %v697_v61 = vmul.f32 %v1352_v58, %v691_v57 }
 0xa59   :  { %v1585_v59 = vpop.eup %1584 }
 0xa5a   :  { %v692_v60 = vmul.f32 %v1585_v59, %v676_v44  ;;  %v1828_v1 = vadd.f32 %v1353_v62, %v697_v61  ;;  %v1558_v44 = vld [vmem:[#allocation5 + $0x88] sm:$0xff]  }
 0xa5c   :  { %v698_v63 = vmul.f32 %v1352_v58, %v692_v60 }
 0xa5e   :  { %v1830_v2 = vadd.f32 %v1353_v62, %v698_v63 }
 0xa60   :  { %v733_v5 = vpack.c.bf16 %v1830_v2, %v1828_v1 }
 0xa62   :  { %1481 = vmatmul.mubr.msk.bf16.vlgmr.msra.gmra.mxu0 %vm112_vm1, %v733_v5 }
 0xa63   :  { %1485 = vmatpush3.bf16.msra.mxu0 %v1759_v7  ;;  %1486 = vmatprep.mubr.msk.bf16.mxu0 %vm1700_vm0, %v1699_v0 }
 0xb22   :  { %v787_v8 = vpop.f32.mrf.mxu0 }
 0xb23   :  { %v788_v9 = vadd.f32 %v1354_v6, %v787_v8 }
 0xb24   :  { %v1482_v10 = vpop.f32.mrf.mxu0 }
 0xb25   :  { %v794_v11 = vsel %vm157_vm3, %v788_v9, -inf  ;;  %v1362_v10 = vld [vmem:[#allocation7 + $0x9] ss:$0 sm:$0xff] }
 0xb26   :  { %795 = vmax.xlane.f32.xlu1 %v794_v11  ;;  %v790_v12 = vpop.f32.mrf.mxu0 }
 0xb27   :  { %v791_v13 = vadd.f32 %v1354_v6, %v790_v12 }
 0xb28   :  { %v1483_v14 = vpop.f32.mrf.mxu0 }
 0xb29   :  { %v797_v15 = vsel %vm157_vm3, %v791_v13, -inf  ;;  %v916_v16 = vpack.c.bf16 %v791_v13, %v788_v9 }
 0xb2a   :  { %798 = vmax.xlane.f32.xlu0 %v797_v15 }
 0xb2b   :  { %1496 = vmatprep.subr.bf16.mxu0 %v916_v16 }
 0xbaf   :  { %v796_v17 = vpop.xlane.xlu1 %795 }
 0xbb0   :  { %v800_v7 = vsub.f32 %v788_v9, %v796_v17 }
 0xbb2   :  { %v802_v18 = vmul.f32 1.442695, %v800_v7 }
 0xbb3   :  { %v799_v19 = vpop.xlane.xlu0 %798 }
 0xbb4   :  { %v801_v20 = vsub.f32 %v791_v13, %v799_v19  ;;  %1586 = vpow2.f32 %v802_v18 }
 0xbb6   :  { %v804_v21 = vmul.f32 1.442695, %v801_v20 }
 0xbb8   :  { %1588 = vpow2.f32 %v804_v21 }
 0xbc1   :  { %v1587_v22 = vpop.eup %1586 }
 0xbc5   :  { %v1589_v23 = vpop.eup %1588 }
 0xbc6   :  { %v806_v24 = vpack.c.bf16 %v1589_v23, %v1587_v22 }
 0xbc8   :  { %808 = vrot.lane.b32.xlu1 %v806_v24, %s1701_s0 }
 0xc3a   :  { %v809_v25 = vpop.permute.xlu1 %808 }
 0xc3b   :  { %1487 = vmatmul.mubr.msk.bf16.vlgmr.msra.gmra.mxu0 %vm179_vm4, %v809_v25 }
 0xc3c   :  { %1497 = vmatpush3.bf16.msra.mxu0 %v916_v16  ;;  %1498 = vmatprep.mubr.msk.bf16.mxu0 %vm309_vm5, %v1765_v27 }
 0xc3d   :  { %1510 = vmatprep.subr.bf16.mxu0 %v1699_v0 }
 0xc43   :  { %1499 = vmatmul.mubr.msk.bf16.vlgmr.msra.gmra.mxu0 %vm309_vm5, %v1771_v29 }
 0xc44   :  { %1514 = vmatprep.mubr.msk.bf16.mxu0 %vm1700_vm0, %v1699_v0 }
 0xcfb   :  { %v847_v26 = vpop.f32.mrf.mxu0 }
 0xcfc   :  { %v854_v28 = vmax.f32 %v847_v26, 1e-30 }
 0xcfd   :  { %v1488_v30 = vpop.f32.mrf.mxu0 }
 0xcfe   :  { %1590 = vrcp.f32 %v854_v28 }
 0xcff   :  { %v850_v31 = vpop.f32.mrf.mxu0 }
 0xd00   :  { %v855_v32 = vmax.f32 %v850_v31, 1e-30  ;;  %v1560_v31 = vld [vmem:[#allocation5 + $0x98] sm:$0xff]  }
 0xd01   :  { %v1489_v33 = vpop.f32.mrf.mxu0  ;;  %1511 = vmatpush3.bf16.msra.mxu0 %v1560_v31 }
 0xd02   :  { %1592 = vrcp.f32 %v855_v32  ;;  %1512 = vmatprep.subr.bf16.mxu0 %v1699_v0 }
 0xd03   :  { %v1500_v27 = vpop.f32.mrf.mxu0 }
 0xd05   :  { %v951_v38 = vpop.f32.mrf.mxu0 }
 0xd07   :  { %v1501_v4 = vpop.f32.mrf.mxu0 }
 0xd09   :  { %v954_v45 = vpop.f32.mrf.mxu0 }
 0xd0b   :  { %v1591_v34 = vpop.eup %1590 }
 0xd0c   :  { %860 = vrot.lane.b32.xlu0 %v1591_v34, %s1702_s2 }
 0xd0f   :  { %v1593_v35 = vpop.eup %1592 }
 0xd10   :  { %862 = vrot.lane.b32.xlu1 %v1593_v35, %s1702_s2  ;;  %990 = vrot.lane.b32.xlu0 %v1500_v27, %s1693_s15 }
 0xd14   :  { %968 = vrot.lane.b32.xlu0 %v788_v9, %s1702_s2 }
 0xd7e   :  { %v861_v29 = vpop.permute.xlu0 %860 }
 0xd7f   :  { %v866_v36 = vmul.f32 %v1587_v22, %v861_v29 }
 0xd82   :  { %v863_v3 = vpop.permute.xlu1 %862  ;;  %v991_v46 = vpop.permute.xlu0 %990 }
 0xd83   :  { %v867_v37 = vmul.f32 %v1589_v23, %v863_v3 }
 0xd85   :  { %v868_v39 = vpack.c.bf16 %v867_v37, %v866_v36  ;;  %v1366_v37 = vld [vmem:[#allocation7 + $0xa] ss:$0 sm:$0xff] }
 0xd86   :  { %v969_v54 = vpop.permute.xlu0 %968 }
 0xd87   :  { %870 = vrot.lane.b32.xlu1 %v868_v39, %s1701_s0 }
 0xd8b   :  { %992 = vrot.lane.b32.xlu1 %v1501_v4, %s1693_s15 }
 0xd8f   :  { %970 = vrot.lane.b32.xlu1 %v791_v13, %s1702_s2 }
 0xdf9   :  { %v871_v40 = vpop.permute.xlu1 %870 }
 0xdfa   :  { %1493 = vmatmul.mubr.msk.bf16.vlgmr.msra.gmra.mxu1 %vm179_vm4, %v871_v40  ;;  %v1367_v40 = vld [vmem:[#allocation7 + $0xb] ss:$0 sm:$0xff] }
 0xdfb   :  { %1506 = vmatprep.mubr.msk.bf16.mxu1 %vm1700_vm0, %v1699_v0  ;;  %1503 = vmatpush3.bf16.msra.mxu1 %v1558_v44 }
 0xdfc   :  { %1504 = vmatprep.subr.bf16.mxu1 %v1699_v0 }
 0xdfd   :  { %v993_v52 = vpop.permute.xlu1 %992 }
 0xdff   :  { %1505 = vmatpush3.bf16.msra.mxu1 %v1559_v48  ;;  %v1565_v48 = vld [vmem:[#allocation5 + $0xa0] sm:$0xff]  }
 0xe00   :  { %1518 = vmatprep.subr.bf16.mxu1 %v1699_v0 }
 0xe01   :  { %v971_v55 = vpop.permute.xlu1 %970 }
 0xeba   :  { %v909_v41 = vpop.f32.mrf.mxu1 }
 0xebb   :  { %v976_v42 = vmul.f32 %v951_v38, %v909_v41  ;;  %v996_v49 = vmul.f32 %v991_v46, %v909_v41  ;;  %v974_v58 = vmul.f32 %v969_v54, %v909_v41  ;;  %v1563_v46 = vld [vmem:[#allocation5 + $0xb0] sm:$0xff]  }
 0xebc   :  { %v1494_v43 = vpop.f32.mrf.mxu1 }
 0xebd   :  { %980 = vrot.lane.b32.xlu0 %v976_v42, %s1702_s2 }
 0xebe   :  { %v912_v47 = vpop.f32.mrf.mxu1 }
 0xebf   :  { %v977_v50 = vmul.f32 %v954_v45, %v912_v47  ;;  %v997_v53 = vmul.f32 %v993_v52, %v912_v47  ;;  %v975_v59 = vmul.f32 %v971_v55, %v912_v47  ;;  %v1562_v45 = vld [vmem:[#allocation5 + $0xb8] sm:$0xff]   ;;  %v1564_v47 = vld [vmem:[#allocation5 + $0xa8] sm:$0xff]  }
 0xec0   :  { %v1495_v51 = vpop.f32.mrf.mxu1 }
 0xec1   :  { %1000 = vrot.lane.b32.xlu0 %v996_v49, %s1701_s0  ;;  %982 = vrot.lane.b32.xlu1 %v977_v50, %s1702_s2  ;;  %v1368_v49 = vld [vmem:[#allocation7 + $0xc] ss:$0 sm:$0xff] }
 0xec5   :  { %1002 = vrot.lane.b32.xlu1 %v997_v53, %s1701_s0 }
 0xf2f   :  { %v981_v56 = vpop.permute.xlu0 %980 }
 0xf30   :  { %v986_v61 = vadd.f32 %v981_v56, %v974_v58 }
 0xf33   :  { %v983_v57 = vpop.permute.xlu1 %982  ;;  %v1001_v60 = vpop.permute.xlu0 %1000 }
 0xf34   :  { %v987_v62 = vadd.f32 %v983_v57, %v975_v59  ;;  %v1006_v5 = vadd.f32 %v1001_v60, %v986_v61 }
 0xf37   :  { %v1003_v63 = vpop.permute.xlu1 %1002 }
 0xf38   :  { %v1007_v6 = vadd.f32 %v1003_v63, %v987_v62 }
 0xf3a   :  { %v1008_v8 = vpack.c.bf16 %v1007_v6, %v1006_v5 }
 0xf3c   :  { %1014 = vrot.lane.b32.xlu0 %v1008_v8, %s1701_s0 }
 0xfae   :  { %v1015_v9 = vpop.permute.xlu0 %1014 }
 0xfaf   :  { %1507 = vmatmul.mubr.msk.bf16.vlgmr.msra.gmra.mxu1 %vm112_vm1, %v1015_v9 }
 0xfb0   :  { %1526 = vmatprep.mubr.msk.bf16.mxu1 %vm1700_vm0, %v1699_v0  ;;  %1519 = vmatpush3.bf16.msra.mxu1 %v1562_v45 }
 0xfb1   :  { %1520 = vmatprep.subr.bf16.mxu1 %v1699_v0 }
 0xfb4   :  { %1521 = vmatpush3.bf16.msra.mxu1 %v1563_v46 }
 0xfb5   :  { %1522 = vmatprep.subr.bf16.mxu1 %v1699_v0 }
 0xfb8   :  { %1523 = vmatpush3.bf16.msra.mxu1 %v1564_v47 }
 0xfb9   :  { %1524 = vmatprep.subr.bf16.mxu1 %v1699_v0 }
 0xfbc   :  { %1525 = vmatpush3.bf16.msra.mxu1 %v1565_v48 }
0x106f   :  { %v1065_v11 = vpop.f32.mrf.mxu1 }
0x1070   :  { %v1066_v12 = vadd.f32 %v1362_v10, %v1065_v11 }
0x1071   :  { %v1508_v13 = vpop.f32.mrf.mxu1 }
0x1072   :  { %v1072_v14 = vadd.f32 %v1066_v12, %v1828_v1 }
0x1073   :  { %v1068_v15 = vpop.f32.mrf.mxu1 }
0x1074   :  { %v1069_v16 = vadd.f32 %v1362_v10, %v1068_v15  ;;  %v1074_v17 = vsel %vm112_vm1, %v1072_v14, 0.0 }
0x1075   :  { %1075 = vadd.xlane.f32.xlu1 %v1074_v17  ;;  %v1509_v7 = vpop.f32.mrf.mxu1 }
0x1076   :  { %v1073_v18 = vadd.f32 %v1069_v16, %v1830_v2  ;;  %v1561_v2 = vld [vmem:[#allocation5 + $0x90] sm:$0xff]   ;;  %v1372_v16 = vld [vmem:[#allocation7 + $0xd] ss:$0 sm:$0xff] }
0x1077   :  { %1513 = vmatpush3.bf16.msra.mxu0 %v1561_v2 }
0x1078   :  { %v1077_v19 = vsel %vm112_vm1, %v1073_v18, 0.0 }
0x1079   :  { %1078 = vadd.xlane.f32.xlu0 %v1077_v19 }
0x10fe   :  { %v1076_v20 = vpop.xlane.xlu1 %1075 }
0x10ff   :  { %v1080_v21 = vmul.f32 0.03125, %v1076_v20 }
0x1101   :  { %v1082_v22 = vsub.f32 %v1072_v14, %v1080_v21 }
0x1102   :  { %v1079_v23 = vpop.xlane.xlu0 %1078 }
0x1103   :  { %v1081_v24 = vmul.f32 0.03125, %v1079_v23  ;;  %v1084_v25 = vmul.f32 %v1082_v22, %v1082_v22 }
0x1105   :  { %v1083_v26 = vsub.f32 %v1073_v18, %v1081_v24  ;;  %v1086_v1 = vsel %vm112_vm1, %v1084_v25, 0.0 }
0x1106   :  { %1087 = vadd.xlane.f32.xlu0 %v1086_v1 }
0x1107   :  { %v1085_v28 = vmul.f32 %v1083_v26, %v1083_v26 }
0x1109   :  { %v1089_v30 = vsel %vm112_vm1, %v1085_v28, 0.0 }
0x110a   :  { %1090 = vadd.xlane.f32.xlu1 %v1089_v30 }
0x118f   :  { %v1088_v32 = vpop.xlane.xlu0 %1087 }
0x1190   :  { %v1092_v33 = vmul.f32 0.03125, %v1088_v32 }
0x1192   :  { %v1094_v34 = vadd.f32 1e-12, %v1092_v33 }
0x1193   :  { %v1091_v27 = vpop.xlane.xlu1 %1090 }
0x1194   :  { %1594 = vrsqrt.f32 %v1094_v34  ;;  %v1093_v35 = vmul.f32 0.03125, %v1091_v27 }
0x1196   :  { %v1095_v29 = vadd.f32 1e-12, %v1093_v35 }
0x1198   :  { %1596 = vrsqrt.f32 %v1095_v29 }
0x11a1   :  { %v1595_v3 = vpop.eup %1594 }
0x11a2   :  { %v1098_v36 = vmul.f32 %v1595_v3, %v1082_v22 }
0x11a4   :  { %v1104_v4 = vmul.f32 %v1366_v37, %v1098_v36 }
0x11a5   :  { %v1597_v38 = vpop.eup %1596 }
0x11a6   :  { %v1099_v39 = vmul.f32 %v1597_v38, %v1083_v26  ;;  %v1110_v42 = vadd.f32 %v1367_v40, %v1104_v4  ;;  %v1378_v4 = vld [vmem:[#allocation7 + $0xe] ss:$0 sm:$0xff] }
0x11a8   :  { %v1105_v41 = vmul.f32 %v1366_v37, %v1099_v39 }
0x11aa   :  { %v1111_v43 = vadd.f32 %v1367_v40, %v1105_v41  ;;  %v1379_v41 = vld [vmem:[#allocation7 + $0xf] ss:$0 sm:$0xff] }
0x11ac   :  { %v1112_v44 = vpack.c.bf16 %v1111_v43, %v1110_v42 }
0x11ae   :  { %1515 = vmatmul.mubr.msk.bf16.vlgmr.msra.gmra.mxu0 %vm112_vm1, %v1112_v44 }
0x126e   :  { %v1166_v50 = vpop.f32.mrf.mxu0 }
0x126f   :  { %v1167_v51 = vadd.f32 %v1368_v49, %v1166_v50 }
0x1270   :  { %v1516_v52 = vpop.f32.mrf.mxu0 }
0x1271   :  { %v1175_v53 = vmul.f32 0.044715, %v1167_v51  ;;  %v1173_v10 = vmul.f32 0.5, %v1167_v51 }
0x1272   :  { %v1169_v54 = vpop.f32.mrf.mxu0 }
0x1273   :  { %v1177_v55 = vmul.f32 %v1175_v53, %v1167_v51  ;;  %v1170_v56 = vadd.f32 %v1368_v49, %v1169_v54 }
0x1274   :  { %v1517_v57 = vpop.f32.mrf.mxu0 }
0x1275   :  { %v1179_v58 = vmul.f32 %v1177_v55, %v1167_v51  ;;  %v1176_v59 = vmul.f32 0.044715, %v1170_v56  ;;  %v1174_v11 = vmul.f32 0.5, %v1170_v56 }
0x1277   :  { %v1181_v60 = vadd.f32 %v1179_v58, %v1167_v51  ;;  %v1178_v61 = vmul.f32 %v1176_v59, %v1170_v56 }
0x1279   :  { %v1183_v62 = vmul.f32 0.7978846, %v1181_v60  ;;  %v1180_v63 = vmul.f32 %v1178_v61, %v1170_v56 }
0x127b   :  { %1598 = vtanh.f32 %v1183_v62  ;;  %v1182_v5 = vadd.f32 %v1180_v63, %v1170_v56 }
0x127d   :  { %v1184_v6 = vmul.f32 0.7978846, %v1182_v5 }
0x127f   :  { %1600 = vtanh.f32 %v1184_v6 }
0x1288   :  { %v1599_v0 = vpop.eup %1598 }
0x1289   :  { %v1187_v8 = vadd.f32 1.0, %v1599_v0 }
0x128b   :  { %v1189_v13 = vmul.f32 %v1187_v8, %v1173_v10 }
0x128c   :  { %v1601_v9 = vpop.eup %1600 }
0x128d   :  { %v1188_v12 = vadd.f32 1.0, %v1601_v9 }
0x128f   :  { %v1190_v14 = vmul.f32 %v1188_v12, %v1174_v11 }
0x1291   :  { %v1191_v15 = vpack.c.bf16 %v1190_v14, %v1189_v13 }
0x1293   :  { %1527 = vmatmul.mubr.msk.bf16.vlgmr.msra.gmra.mxu1 %vm620_vm6, %v1191_v15 }
0x1353   :  { %v1257_v17 = vpop.f32.mrf.mxu1 }
0x1354   :  { %v1258_v7 = vadd.f32 %v1372_v16, %v1257_v17 }
0x1355   :  { %v1528_v18 = vpop.f32.mrf.mxu1 }
0x1356   :  { %v1264_v19 = vadd.f32 %v1258_v7, %v1110_v42 }
0x1357   :  { %v1260_v20 = vpop.f32.mrf.mxu1 }
0x1358   :  { %v1261_v21 = vadd.f32 %v1372_v16, %v1260_v20  ;;  %v1266_v22 = vsel %vm112_vm1, %v1264_v19, 0.0 }
0x1359   :  { %1267 = vadd.xlane.f32.xlu0 %v1266_v22  ;;  %v1529_v23 = vpop.f32.mrf.mxu1 }
0x135a   :  { %v1265_v24 = vadd.f32 %v1261_v21, %v1111_v43 }
0x135c   :  { %v1269_v25 = vsel %vm112_vm1, %v1265_v24, 0.0 }
0x135d   :  { %1270 = vadd.xlane.f32.xlu1 %v1269_v25 }
0x13e2   :  { %v1268_v26 = vpop.xlane.xlu0 %1267 }
0x13e3   :  { %v1272_v1 = vmul.f32 0.03125, %v1268_v26 }
0x13e5   :  { %v1274_v28 = vsub.f32 %v1264_v19, %v1272_v1 }
0x13e6   :  { %v1271_v30 = vpop.xlane.xlu1 %1270 }
0x13e7   :  { %v1273_v31 = vmul.f32 0.03125, %v1271_v30  ;;  %v1276_v2 = vmul.f32 %v1274_v28, %v1274_v28 }
0x13e9   :  { %v1275_v32 = vsub.f32 %v1265_v24, %v1273_v31  ;;  %v1278_v33 = vsel %vm112_vm1, %v1276_v2, 0.0 }
0x13ea   :  { %1279 = vadd.xlane.f32.xlu0 %v1278_v33 }
0x13eb   :  { %v1277_v34 = vmul.f32 %v1275_v32, %v1275_v32 }
0x13ed   :  { %v1281_v27 = vsel %vm112_vm1, %v1277_v34, 0.0 }
0x13ee   :  { %1282 = vadd.xlane.f32.xlu1 %v1281_v27 }
0x1473   :  { %v1280_v35 = vpop.xlane.xlu0 %1279 }
0x1474   :  { %v1284_v29 = vmul.f32 0.03125, %v1280_v35 }
0x1476   :  { %v1286_v3 = vadd.f32 1e-12, %v1284_v29 }
0x1477   :  { %v1283_v36 = vpop.xlane.xlu1 %1282 }
0x1478   :  { %1602 = vrsqrt.f32 %v1286_v3  ;;  %v1285_v37 = vmul.f32 0.03125, %v1283_v36 }
0x147a   :  { %v1287_v38 = vadd.f32 1e-12, %v1285_v37 }
0x147c   :  { %1604 = vrsqrt.f32 %v1287_v38 }
0x1485   :  { %v1603_v39 = vpop.eup %1602 }
0x1486   :  { %v1290_v40 = vmul.f32 %v1603_v39, %v1274_v28 }
0x1488   :  { %v1296_v42 = vmul.f32 %v1378_v4, %v1290_v40 }
0x1489   :  { %v1605_v43 = vpop.eup %1604 }
0x148a   :  { %v1291_v44 = vmul.f32 %v1605_v43, %v1275_v32  ;;  %v1302_v45 = vadd.f32 %v1379_v41, %v1296_v42 }
0x148c   :  { %v1297_v46 = vmul.f32 %v1378_v4, %v1291_v44  ;;  %1304 = vst.msk [vmem:[#allocation8] sm:$0xff] %vm112_vm1, %v1302_v45 }
0x148e   :  { %v1303_v47 = vadd.f32 %v1379_v41, %v1297_v46 }
0x1490   :  { %1305 = vst.msk [vmem:[#allocation8 + $0x8] sm:$0xff] %vm112_vm1, %v1303_v47 }
0x1491   :  { %1677 = shalt.err (!%p1674_p5)
}
0x1492   :  { %1317 = dma.vmem_to_hbm [thread:$0]  %s1312_s4, 256, %s1896_s3, [#allocation4], %s1696_s22, %s1696_s22, %s1697_s23  }
0x1493   :  { %1690 = dma.done.wait [#allocation4], 256  }
0x1494   :  { %1691 = vsyncadd [#allocation4], 4294967040 }
0x1495   :  { %1321 = vsyncpa [#allocation3], 1 }
0x1496   :  { %1322 = vsyncpa [#allocation6], 1 }
0x1497   :  { %1323 = vsyncpa [#allocation4], 1 }

</bundles_post_ra>
